<compile_context>
chip_gen: v5e
topology: v5e:2x2
jax: 0.10.0
libtpu: 0.0.40
codegen_flags: <defaults>
</compile_context>

<pallas_src>
import functools

import numpy as np
import jax
import jax.numpy as jnp
from jax import lax
from jax.experimental import pallas as pl
from jax.experimental.pallas import tpu as pltpu

EPS = 1e-12  # matches torch F.normalize default eps


def _patch_netvlad_kernel(x_ref, wt_ref, cent_ref, pool_ref, e_ref, g_ref, t_ref,
                          local_ref, global_ref, *, patch_size):
    # x_ref: (N, C); wt_ref: (C, K); cent_ref: (1, K*C); pool_ref: (Np, N)
    # e_ref: (K, K*C) 0/1 expand; g_ref: (K*C, K) 0/1 group-sum; t_ref: (C, K*C) 0/1 tile
    # local_ref: (Np, K*C); global_ref: (1, K*C)
    eps2 = EPS * EPS
    x = x_ref[...]                                                  # (N, C)

    # ---- per-pixel L2 normalization over channels ----
    inv_pix = lax.rsqrt(jnp.maximum(jnp.sum(x * x, axis=1, keepdims=True), eps2))
    xn = x * inv_pix                                                # (N, C)

    # ---- 1x1 conv (no bias, vlad_v2=False) + softmax over clusters ----
    # Tiny matmul; kept at HIGHEST because softmax amplifies logit error.
    logits = jnp.dot(xn, wt_ref[...], preferred_element_type=jnp.float32,
                     precision=lax.Precision.HIGHEST)               # (N, K)
    m = jnp.max(logits, axis=1, keepdims=True)
    ea = jnp.exp(logits - m)
    a = ea / jnp.sum(ea, axis=1, keepdims=True)                     # (N, K)

    E = e_ref[...]                                                  # (K, K*C)
    G = g_ref[...]                                                  # (K*C, K)
    T = t_ref[...]                                                  # (C, K*C)
    cent = cent_ref[...]                                            # (1, K*C)

    # ---- batched (over clusters) weighted features: wmat[n,kC+c] = a[n,k]*xn[n,c]
    a_exp = jnp.dot(a, E, preferred_element_type=jnp.float32)       # (N, K*C)
    xn_t = jnp.dot(xn, T, preferred_element_type=jnp.float32)       # (N, K*C)
    wmat = a_exp * xn_t                                             # (N, K*C)

    a_sum = jnp.sum(a, axis=0, keepdims=True)                       # (1, K)

    # -------- global VLAD --------
    g_raw = (jnp.sum(wmat, axis=0, keepdims=True)
             - jnp.dot(a_sum, E, preferred_element_type=jnp.float32) * cent)   # (1, K*C)
    g_grp = jnp.dot(g_raw * g_raw, G, preferred_element_type=jnp.float32)      # (1, K)
    g_n = g_raw * jnp.dot(lax.rsqrt(jnp.maximum(g_grp, eps2)), E,
                          preferred_element_type=jnp.float32)       # intra-norm over C
    g_out = g_n * lax.rsqrt(jnp.maximum(jnp.sum(g_n * g_n, axis=1, keepdims=True), eps2))
    global_ref[...] = g_out                                         # single lane-dense store

    # -------- local (patch) VLAD --------
    pool = pool_ref[...]                                            # (Np, N) 0/1
    inv_area = 1.0 / float(patch_size * patch_size)
    box_w = jnp.dot(pool, wmat, preferred_element_type=jnp.float32)   # (Np, K*C)
    box_a = jnp.dot(pool, a, preferred_element_type=jnp.float32)      # (Np, K)
    pooled = (box_w - jnp.dot(box_a, E, preferred_element_type=jnp.float32) * cent) * inv_area
    l_grp = jnp.dot(pooled * pooled, G, preferred_element_type=jnp.float32)    # (Np, K)
    l_n = pooled * jnp.dot(lax.rsqrt(jnp.maximum(l_grp, eps2)), E,
                           preferred_element_type=jnp.float32)      # intra-norm over C
    l_out = l_n * lax.rsqrt(jnp.maximum(jnp.sum(l_n * l_n, axis=1, keepdims=True), eps2))
    local_ref[...] = l_out                                          # single lane-dense store


def _make_pool_matrix(H, W, patch_size, stride):
    oH = (H - patch_size) // stride + 1
    oW = (W - patch_size) // stride + 1
    P = np.zeros((oH * oW, H * W), dtype=np.float32)
    for i in range(oH):
        for j in range(oW):
            p = i * oW + j
            for di in range(patch_size):
                for dj in range(patch_size):
                    P[p, (i * stride + di) * W + (j * stride + dj)] = 1.0
    return jnp.asarray(P)


def _make_helper_matrices(K, C):
    KC = K * C
    E = np.zeros((K, KC), dtype=np.float32)        # expand: E[k, k*C+c] = 1
    T = np.zeros((C, KC), dtype=np.float32)        # tile:   T[c, k*C+c] = 1
    for k in range(K):
        E[k, k * C:(k + 1) * C] = 1.0
        T[np.arange(C), k * C + np.arange(C)] = 1.0
    return jnp.asarray(E), jnp.asarray(E.T.copy()), jnp.asarray(T)


def patch_netvlad_forward(x_nchw, conv_w, centroids, patch_sizes=(4,), strides=(1,)):
    """x_nchw: (B, C, H, W); conv_w: (K, C, 1, 1); centroids: (K, C).
    Returns (vlad_local list of (B, K*C, Np_i), vlad_global (B, K*C))."""
    B, C, H, W = x_nchw.shape
    K = conv_w.shape[0]
    N = H * W
    KC = K * C

    x_nc = jnp.transpose(x_nchw, (0, 2, 3, 1)).reshape(B, N, C).astype(jnp.float32)
    wt = jnp.transpose(conv_w.reshape(K, C)).astype(jnp.float32)     # (C, K)
    cent_flat = centroids.reshape(1, KC).astype(jnp.float32)         # (1, K*C)
    E, G, T = _make_helper_matrices(K, C)

    vlad_local = []
    vlad_global = None
    for ps, st in zip(patch_sizes, strides):
        oH = (H - ps) // st + 1
        oW = (W - ps) // st + 1
        Np = oH * oW
        pool = _make_pool_matrix(H, W, ps, st)                        # (Np, N)

        kern = functools.partial(_patch_netvlad_kernel, patch_size=ps)
        out_local, out_global = pl.pallas_call(
            kern,
            out_shape=(jax.ShapeDtypeStruct((B, Np, KC), jnp.float32),
                       jax.ShapeDtypeStruct((B, 1, KC), jnp.float32)),
            grid_spec=pltpu.PrefetchScalarGridSpec(
                num_scalar_prefetch=0,
                grid=(B,),
                in_specs=[
                    pl.BlockSpec((None, N, C), lambda b: (b, 0, 0)),   # x
                    # Grid-invariant operands below are never re-fetched
                    # (constant index_map); small enough that default
                    # double-buffering is harmless at these shapes.
                    pl.BlockSpec((C, K), lambda b: (0, 0)),            # wt
                    pl.BlockSpec((1, KC), lambda b: (0, 0)),           # centroids (flat)
                    pl.BlockSpec((Np, N), lambda b: (0, 0)),           # pool matrix
                    pl.BlockSpec((K, KC), lambda b: (0, 0)),           # E
                    pl.BlockSpec((KC, K), lambda b: (0, 0)),           # G = E.T
                    pl.BlockSpec((C, KC), lambda b: (0, 0)),           # T
                ],
                out_specs=[
                    pl.BlockSpec((None, Np, KC), lambda b: (b, 0, 0)),  # local (lane-dense)
                    pl.BlockSpec((None, 1, KC), lambda b: (b, 0, 0)),   # global (lane-dense)
                ],
            ),
            compiler_params=pltpu.CompilerParams(
                dimension_semantics=("parallel",)),
        )(x_nc, wt, cent_flat, pool, E, G, T)

        # (B, Np, K*C) -> (B, K*C, Np)  (matches torch layout k*C + c, p)
        vlad_local.append(jnp.transpose(out_local, (0, 2, 1)))
        if vlad_global is None:
            vlad_global = out_global.reshape(B, KC)
    return vlad_local, vlad_global


# ---------------- pure-JAX reference (mirrors the PyTorch forward) -------------
def reference_forward(x, w, cent, patch_size, stride):
    B, C, H, W = x.shape
    K = w.shape[0]
    nrm = jnp.sqrt(jnp.sum(x * x, axis=1, keepdims=True))
    xn = x / jnp.maximum(nrm, EPS)
    logits = jnp.einsum('bchw,kc->bkhw', xn, w, precision='highest')
    a = jax.nn.softmax(logits, axis=1)
    resid = a[:, :, None, :, :] * (xn[:, None, :, :, :]
                                   - cent[None, :, :, None, None])   # (B,K,C,H,W)
    vg = resid.sum(axis=(3, 4))                                       # (B,K,C)
    vg = vg / jnp.maximum(jnp.linalg.norm(vg, axis=2, keepdims=True), EPS)
    vg = vg.reshape(B, K * C)
    vg = vg / jnp.maximum(jnp.linalg.norm(vg, axis=1, keepdims=True), EPS)

    sr = resid.reshape(B, K * C, H, W)
    box = lax.reduce_window(sr, 0.0, lax.add,
                            window_dimensions=(1, 1, patch_size, patch_size),
                            window_strides=(1, 1, stride, stride),
                            padding='VALID') / (patch_size ** 2)
    oH, oW = box.shape[2], box.shape[3]
    vl = box.reshape(B, K, C, oH * oW)
    vl = vl / jnp.maximum(jnp.linalg.norm(vl, axis=2, keepdims=True), EPS)
    vl = vl.reshape(B, K * C, oH * oW)
    vl = vl / jnp.maximum(jnp.linalg.norm(vl, axis=1, keepdims=True), EPS)
    return vl, vg


if __name__ == "__main__":
    # Small, module-consistent shapes:
    #   batch B=2, encoding_dim C=32, spatial H=W=8, num_clusters K=8
    #   patch_sizes='4', strides='1'  (defaults of the module)
    B, C, H, W, K = 2, 32, 8, 8, 8
    ps, st = 4, 1

    key = jax.random.PRNGKey(0)
    kx, kw, kc = jax.random.split(key, 3)
    x = jax.random.normal(kx, (B, C, H, W), jnp.float32)
    # deterministic synthetic parameters (same shapes as the nn.Module's params):
    conv_w = jax.random.normal(kw, (K, C, 1, 1), jnp.float32) * 0.5  # Conv2d(C,K,1,1), bias=False
    centroids = jax.random.uniform(kc, (K, C), jnp.float32)          # torch.rand(K, C)

    vlad_local, vlad_global = patch_netvlad_forward(x, conv_w, centroids, (ps,), (st,))
    jax.block_until_ready(vlad_global)
    for v in vlad_local:
        jax.block_until_ready(v)

    vl_ref, vg_ref = reference_forward(x, conv_w.reshape(K, C), centroids, ps, st)
    # Tolerance accounts for default (bf16-pass) MXU precision on the large
    # expansion/pooling matmuls (f32 accumulation kept via preferred_element_type).
    np.testing.assert_allclose(np.asarray(vlad_local[0]), np.asarray(vl_ref),
                               rtol=2e-2, atol=2e-3)
    np.testing.assert_allclose(np.asarray(vlad_global), np.asarray(vg_ref),
                               rtol=2e-2, atol=2e-3)
    print("KERNEL_OK")
</pallas_src>

<mosaic_0001>
module attributes {stable_mosaic.version = 11 : i64} {
  func.func @_patch_netvlad_kernel(%arg0: i32, %arg1: memref<1x64x32xf32, #tpu.memory_space<vmem>>, %arg2: memref<32x8xf32, #tpu.memory_space<vmem>>, %arg3: memref<1x256xf32, #tpu.memory_space<vmem>>, %arg4: memref<25x64xf32, #tpu.memory_space<vmem>>, %arg5: memref<8x256xf32, #tpu.memory_space<vmem>>, %arg6: memref<256x8xf32, #tpu.memory_space<vmem>>, %arg7: memref<32x256xf32, #tpu.memory_space<vmem>>, %arg8: memref<1x25x256xf32, #tpu.memory_space<vmem>>, %arg9: memref<1x1x256xf32, #tpu.memory_space<vmem>>) attributes {dimension_semantics = [#tpu.dimension_semantics<parallel>], iteration_bounds = array<i64: 2>, scalar_prefetch = 0 : i64, scratch_operands = 0 : i64, tpu.core_type = #tpu.core_type<tc>, window_params = [{transform_indices = @transform_0, window_bounds = array<i64: 1, 64, 32>}, {pipeline_mode = #tpu.pipeline_mode<synchronous>, transform_indices = @transform_1, window_bounds = array<i64: 32, 8>}, {pipeline_mode = #tpu.pipeline_mode<synchronous>, transform_indices = @transform_2, window_bounds = array<i64: 1, 256>}, {pipeline_mode = #tpu.pipeline_mode<synchronous>, transform_indices = @transform_3, window_bounds = array<i64: 25, 64>}, {pipeline_mode = #tpu.pipeline_mode<synchronous>, transform_indices = @transform_4, window_bounds = array<i64: 8, 256>}, {pipeline_mode = #tpu.pipeline_mode<synchronous>, transform_indices = @transform_5, window_bounds = array<i64: 256, 8>}, {pipeline_mode = #tpu.pipeline_mode<synchronous>, transform_indices = @transform_6, window_bounds = array<i64: 32, 256>}, {transform_indices = @transform_7, window_bounds = array<i64: 1, 25, 256>}, {transform_indices = @transform_8, window_bounds = array<i64: 1, 1, 256>}]} {
    %c0 = arith.constant 0 : index
    %c0_0 = arith.constant 0 : index
    %c0_1 = arith.constant 0 : index
    %0 = vector.load %arg1[%c0, %c0_0, %c0_1] : memref<1x64x32xf32, #tpu.memory_space<vmem>>, vector<1x64x32xf32>
    %1 = vector.shape_cast %0 : vector<1x64x32xf32> to vector<64x32xf32>
    %2 = arith.mulf %1, %1 : vector<64x32xf32>
    %cst = arith.constant dense<0.000000e+00> : vector<64xf32>
    %3 = vector.multi_reduction <add>, %2, %cst [1] : vector<64x32xf32> to vector<64xf32>
    %4 = vector.shape_cast %3 : vector<64xf32> to vector<64x1xf32>
    %cst_2 = arith.constant 1.000000e-24 : f32
    %5 = vector.broadcast %cst_2 : f32 to vector<64x1xf32>
    %6 = arith.maximumf %4, %5 : vector<64x1xf32>
    %7 = math.rsqrt %6 : vector<64x1xf32>
    %8 = vector.broadcast %7 : vector<64x1xf32> to vector<64x32xf32>
    %9 = arith.mulf %1, %8 : vector<64x32xf32>
    %c0_3 = arith.constant 0 : index
    %c0_4 = arith.constant 0 : index
    %10 = vector.load %arg2[%c0_3, %c0_4] : memref<32x8xf32, #tpu.memory_space<vmem>>, vector<32x8xf32>
    %cst_5 = arith.constant dense<0.000000e+00> : vector<64x8xf32>
    %11 = tpu.matmul %9, %10, %cst_5 {dimension_numbers = #tpu.dot_dimension_numbers<[1], [0], [0], [1], [0, 0, 1, 1], [], []>, precision = #tpu.contract_precision<fp32>} : vector<64x32xf32>, vector<32x8xf32>, vector<64x8xf32> -> vector<64x8xf32>
    %cst_6 = arith.constant dense<0xFF800000> : vector<64xf32>
    %12 = vector.multi_reduction <maximumf>, %11, %cst_6 [1] : vector<64x8xf32> to vector<64xf32>
    %13 = vector.shape_cast %12 : vector<64xf32> to vector<64x1xf32>
    %14 = vector.broadcast %13 : vector<64x1xf32> to vector<64x8xf32>
    %15 = arith.subf %11, %14 : vector<64x8xf32>
    %16 = math.exp %15 : vector<64x8xf32>
    %cst_7 = arith.constant dense<0.000000e+00> : vector<64xf32>
    %17 = vector.multi_reduction <add>, %16, %cst_7 [1] : vector<64x8xf32> to vector<64xf32>
    %18 = vector.shape_cast %17 : vector<64xf32> to vector<64x1xf32>
    %19 = vector.broadcast %18 : vector<64x1xf32> to vector<64x8xf32>
    %20 = arith.divf %16, %19 : vector<64x8xf32>
    %c0_8 = arith.constant 0 : index
    %c0_9 = arith.constant 0 : index
    %21 = vector.load %arg5[%c0_8, %c0_9] : memref<8x256xf32, #tpu.memory_space<vmem>>, vector<8x256xf32>
    %c0_10 = arith.constant 0 : index
    %c0_11 = arith.constant 0 : index
    %22 = vector.load %arg6[%c0_10, %c0_11] : memref<256x8xf32, #tpu.memory_space<vmem>>, vector<256x8xf32>
    %c0_12 = arith.constant 0 : index
    %c0_13 = arith.constant 0 : index
    %23 = vector.load %arg7[%c0_12, %c0_13] : memref<32x256xf32, #tpu.memory_space<vmem>>, vector<32x256xf32>
    %c0_14 = arith.constant 0 : index
    %c0_15 = arith.constant 0 : index
    %24 = vector.load %arg3[%c0_14, %c0_15] : memref<1x256xf32, #tpu.memory_space<vmem>>, vector<1x256xf32>
    %cst_16 = arith.constant dense<0.000000e+00> : vector<64x256xf32>
    %25 = tpu.matmul %20, %21, %cst_16 {dimension_numbers = #tpu.dot_dimension_numbers<[1], [0], [0], [1], [0, 0, 1, 1], [], []>} : vector<64x8xf32>, vector<8x256xf32>, vector<64x256xf32> -> vector<64x256xf32>
    %cst_17 = arith.constant dense<0.000000e+00> : vector<64x256xf32>
    %26 = tpu.matmul %9, %23, %cst_17 {dimension_numbers = #tpu.dot_dimension_numbers<[1], [0], [0], [1], [0, 0, 1, 1], [], []>} : vector<64x32xf32>, vector<32x256xf32>, vector<64x256xf32> -> vector<64x256xf32>
    %27 = arith.mulf %25, %26 : vector<64x256xf32>
    %cst_18 = arith.constant dense<0.000000e+00> : vector<8xf32>
    %28 = vector.multi_reduction <add>, %20, %cst_18 [0] : vector<64x8xf32> to vector<8xf32>
    %29 = vector.shape_cast %28 : vector<8xf32> to vector<1x8xf32>
    %cst_19 = arith.constant dense<0.000000e+00> : vector<256xf32>
    %30 = vector.multi_reduction <add>, %27, %cst_19 [0] : vector<64x256xf32> to vector<256xf32>
    %31 = vector.shape_cast %30 : vector<256xf32> to vector<1x256xf32>
    %cst_20 = arith.constant dense<0.000000e+00> : vector<1x256xf32>
    %32 = tpu.matmul %29, %21, %cst_20 {dimension_numbers = #tpu.dot_dimension_numbers<[1], [0], [0], [1], [0, 0, 1, 1], [], []>} : vector<1x8xf32>, vector<8x256xf32>, vector<1x256xf32> -> vector<1x256xf32>
    %33 = arith.mulf %32, %24 : vector<1x256xf32>
    %34 = arith.subf %31, %33 : vector<1x256xf32>
    %35 = arith.mulf %34, %34 : vector<1x256xf32>
    %cst_21 = arith.constant dense<0.000000e+00> : vector<1x8xf32>
    %36 = tpu.matmul %35, %22, %cst_21 {dimension_numbers = #tpu.dot_dimension_numbers<[1], [0], [0], [1], [0, 0, 1, 1], [], []>} : vector<1x256xf32>, vector<256x8xf32>, vector<1x8xf32> -> vector<1x8xf32>
    %cst_22 = arith.constant 1.000000e-24 : f32
    %37 = vector.broadcast %cst_22 : f32 to vector<1x8xf32>
    %38 = arith.maximumf %36, %37 : vector<1x8xf32>
    %39 = math.rsqrt %38 : vector<1x8xf32>
    %cst_23 = arith.constant dense<0.000000e+00> : vector<1x256xf32>
    %40 = tpu.matmul %39, %21, %cst_23 {dimension_numbers = #tpu.dot_dimension_numbers<[1], [0], [0], [1], [0, 0, 1, 1], [], []>} : vector<1x8xf32>, vector<8x256xf32>, vector<1x256xf32> -> vector<1x256xf32>
    %41 = arith.mulf %34, %40 : vector<1x256xf32>
    %42 = arith.mulf %41, %41 : vector<1x256xf32>
    %cst_24 = arith.constant dense<0.000000e+00> : vector<1xf32>
    %43 = vector.multi_reduction <add>, %42, %cst_24 [1] : vector<1x256xf32> to vector<1xf32>
    %44 = vector.shape_cast %43 : vector<1xf32> to vector<1x1xf32>
    %cst_25 = arith.constant 1.000000e-24 : f32
    %45 = vector.broadcast %cst_25 : f32 to vector<1x1xf32>
    %46 = arith.maximumf %44, %45 : vector<1x1xf32>
    %47 = math.rsqrt %46 : vector<1x1xf32>
    %48 = vector.broadcast %47 : vector<1x1xf32> to vector<1x256xf32>
    %49 = arith.mulf %41, %48 : vector<1x256xf32>
    %c0_26 = arith.constant 0 : index
    %c0_27 = arith.constant 0 : index
    %c0_28 = arith.constant 0 : index
    %50 = vector.load %arg9[%c0_26, %c0_27, %c0_28] : memref<1x1x256xf32, #tpu.memory_space<vmem>>, vector<1x1x256xf32>
    %51 = vector.shape_cast %50 : vector<1x1x256xf32> to vector<1x256xf32>
    %52 = vector.shape_cast %49 : vector<1x256xf32> to vector<1x1x256xf32>
    tpu.vector_store %arg9[%c0_26, %c0_27, %c0_28], %52 {strides = array<i32>} : memref<1x1x256xf32, #tpu.memory_space<vmem>>, vector<1x1x256xf32>,
    %c0_29 = arith.constant 0 : index
    %c0_30 = arith.constant 0 : index
    %53 = vector.load %arg4[%c0_29, %c0_30] : memref<25x64xf32, #tpu.memory_space<vmem>>, vector<25x64xf32>
    %cst_31 = arith.constant dense<0.000000e+00> : vector<25x256xf32>
    %54 = tpu.matmul %53, %27, %cst_31 {dimension_numbers = #tpu.dot_dimension_numbers<[1], [0], [0], [1], [0, 0, 1, 1], [], []>} : vector<25x64xf32>, vector<64x256xf32>, vector<25x256xf32> -> vector<25x256xf32>
    %cst_32 = arith.constant dense<0.000000e+00> : vector<25x8xf32>
    %55 = tpu.matmul %53, %20, %cst_32 {dimension_numbers = #tpu.dot_dimension_numbers<[1], [0], [0], [1], [0, 0, 1, 1], [], []>} : vector<25x64xf32>, vector<64x8xf32>, vector<25x8xf32> -> vector<25x8xf32>
    %cst_33 = arith.constant dense<0.000000e+00> : vector<25x256xf32>
    %56 = tpu.matmul %55, %21, %cst_33 {dimension_numbers = #tpu.dot_dimension_numbers<[1], [0], [0], [1], [0, 0, 1, 1], [], []>} : vector<25x8xf32>, vector<8x256xf32>, vector<25x256xf32> -> vector<25x256xf32>
    %57 = vector.broadcast %24 : vector<1x256xf32> to vector<25x256xf32>
    %58 = arith.mulf %56, %57 : vector<25x256xf32>
    %59 = arith.subf %54, %58 : vector<25x256xf32>
    %cst_34 = arith.constant 6.250000e-02 : f32
    %60 = vector.broadcast %cst_34 : f32 to vector<25x256xf32>
    %61 = arith.mulf %59, %60 : vector<25x256xf32>
    %62 = arith.mulf %61, %61 : vector<25x256xf32>
    %cst_35 = arith.constant dense<0.000000e+00> : vector<25x8xf32>
    %63 = tpu.matmul %62, %22, %cst_35 {dimension_numbers = #tpu.dot_dimension_numbers<[1], [0], [0], [1], [0, 0, 1, 1], [], []>} : vector<25x256xf32>, vector<256x8xf32>, vector<25x8xf32> -> vector<25x8xf32>
    %cst_36 = arith.constant 1.000000e-24 : f32
    %64 = vector.broadcast %cst_36 : f32 to vector<25x8xf32>
    %65 = arith.maximumf %63, %64 : vector<25x8xf32>
    %66 = math.rsqrt %65 : vector<25x8xf32>
    %cst_37 = arith.constant dense<0.000000e+00> : vector<25x256xf32>
    %67 = tpu.matmul %66, %21, %cst_37 {dimension_numbers = #tpu.dot_dimension_numbers<[1], [0], [0], [1], [0, 0, 1, 1], [], []>} : vector<25x8xf32>, vector<8x256xf32>, vector<25x256xf32> -> vector<25x256xf32>
    %68 = arith.mulf %61, %67 : vector<25x256xf32>
    %69 = arith.mulf %68, %68 : vector<25x256xf32>
    %cst_38 = arith.constant dense<0.000000e+00> : vector<25xf32>
    %70 = vector.multi_reduction <add>, %69, %cst_38 [1] : vector<25x256xf32> to vector<25xf32>
    %71 = vector.shape_cast %70 : vector<25xf32> to vector<25x1xf32>
    %cst_39 = arith.constant 1.000000e-24 : f32
    %72 = vector.broadcast %cst_39 : f32 to vector<25x1xf32>
    %73 = arith.maximumf %71, %72 : vector<25x1xf32>
    %74 = math.rsqrt %73 : vector<25x1xf32>
    %75 = vector.broadcast %74 : vector<25x1xf32> to vector<25x256xf32>
    %76 = arith.mulf %68, %75 : vector<25x256xf32>
    %c0_40 = arith.constant 0 : index
    %c0_41 = arith.constant 0 : index
    %c0_42 = arith.constant 0 : index
    %77 = vector.load %arg8[%c0_40, %c0_41, %c0_42] : memref<1x25x256xf32, #tpu.memory_space<vmem>>, vector<1x25x256xf32>
    %78 = vector.shape_cast %77 : vector<1x25x256xf32> to vector<25x256xf32>
    %79 = vector.shape_cast %76 : vector<25x256xf32> to vector<1x25x256xf32>
    tpu.vector_store %arg8[%c0_40, %c0_41, %c0_42], %79 {strides = array<i32>} : memref<1x25x256xf32, #tpu.memory_space<vmem>>, vector<1x25x256xf32>,
    return
  }
  func.func @transform_0(%arg0: i32) -> (i32, i32, i32) {
    %c0_i32 = arith.constant 0 : i32
    %c0_i32_0 = arith.constant 0 : i32
    %c0_i32_1 = arith.constant 0 : i32
    return %arg0, %c0_i32, %c0_i32_0 : i32, i32, i32
  }
  func.func @transform_1(%arg0: i32) -> (i32, i32) {
    %c0_i32 = arith.constant 0 : i32
    %c0_i32_0 = arith.constant 0 : i32
    %c0_i32_1 = arith.constant 0 : i32
    return %c0_i32, %c0_i32_0 : i32, i32
  }
  func.func @transform_2(%arg0: i32) -> (i32, i32) {
    %c0_i32 = arith.constant 0 : i32
    %c0_i32_0 = arith.constant 0 : i32
    %c0_i32_1 = arith.constant 0 : i32
    return %c0_i32, %c0_i32_0 : i32, i32
  }
  func.func @transform_3(%arg0: i32) -> (i32, i32) {
    %c0_i32 = arith.constant 0 : i32
    %c0_i32_0 = arith.constant 0 : i32
    %c0_i32_1 = arith.constant 0 : i32
    return %c0_i32, %c0_i32_0 : i32, i32
  }
  func.func @transform_4(%arg0: i32) -> (i32, i32) {
    %c0_i32 = arith.constant 0 : i32
    %c0_i32_0 = arith.constant 0 : i32
    %c0_i32_1 = arith.constant 0 : i32
    return %c0_i32, %c0_i32_0 : i32, i32
  }
  func.func @transform_5(%arg0: i32) -> (i32, i32) {
    %c0_i32 = arith.constant 0 : i32
    %c0_i32_0 = arith.constant 0 : i32
    %c0_i32_1 = arith.constant 0 : i32
    return %c0_i32, %c0_i32_0 : i32, i32
  }
  func.func @transform_6(%arg0: i32) -> (i32, i32) {
    %c0_i32 = arith.constant 0 : i32
    %c0_i32_0 = arith.constant 0 : i32
    %c0_i32_1 = arith.constant 0 : i32
    return %c0_i32, %c0_i32_0 : i32, i32
  }
  func.func @transform_7(%arg0: i32) -> (i32, i32, i32) {
    %c0_i32 = arith.constant 0 : i32
    %c0_i32_0 = arith.constant 0 : i32
    %c0_i32_1 = arith.constant 0 : i32
    return %arg0, %c0_i32, %c0_i32_0 : i32, i32, i32
  }
  func.func @transform_8(%arg0: i32) -> (i32, i32, i32) {
    %c0_i32 = arith.constant 0 : i32
    %c0_i32_0 = arith.constant 0 : i32
    %c0_i32_1 = arith.constant 0 : i32
    return %arg0, %c0_i32, %c0_i32_0 : i32, i32, i32
  }
}

</mosaic_0001>

<bundles_post_ra>
// kernel: tpu_custom_call.1
= control target key start
LH: loop header
LB: loop body
LE: loop exit
PB: predicated region body
PF: predicated region fallthrough
CT: control target
= control target key end

     0   :  { %s3373_s0 = inlined_call_operand.vmem [shape: f32[2,64,32], index: 0, kind: input, shape index: {}]   ;;  %s3374_s1 = inlined_call_operand.vmem [shape: f32[32,8], index: 1, kind: input, shape index: {}]   ;;  %s3375_s2 = inlined_call_operand.vmem [shape: f32[1,256], index: 2, kind: input, shape index: {}]   ;;  %s3376_s3 = inlined_call_operand.vmem [shape: f32[25,64], index: 3, kind: input, shape index: {}]   ;;  %s3377_s4 = inlined_call_operand.vmem [shape: f32[8,256], index: 4, kind: input, shape index: {}]   ;;  %s3378_s5 = inlined_call_operand.vmem [shape: f32[256,8], index: 5, kind: input, shape index: {}]   ;;  %s3379_s6 = inlined_call_operand.vmem [shape: f32[32,256], index: 6, kind: input, shape index: {}]   ;;  %s3380_s7 = inlined_call_operand.vmem [shape: f32[2,25,256], index: 7, kind: output, shape index: {0}]   ;;  %s3381_s8 = inlined_call_operand.hbm [shape: f32[2,1,256], index: 8, kind: output, shape index: {1}]  }
   0x1   :  { %3383 = sst [smem:[#allocation5_spill]] %s3373_s0 }
   0x2   :  { %3384 = sst [smem:[#allocation6_spill]] %s3374_s1 }
   0x3   :  { %14 = vsyncpa [#allocation3], 0 }
   0x4   :  { %16 = vsyncpa [#allocation3 + $0x1], 0  ;;  %s2423_s27 = smov 0   ;;  %s2425_s28 = smov 0  }
   0x5   :  { %s2427_s29 = smov 0   ;;  %s2429_s30 = smov 0  }
   0x6 LB: > { %s2444_s9 = sadd.s32 4294967295, %s2376_s30   ;;  %s2128_s10 = sadd.s32 4294967294, %s2376_s30   ;;  %s2376_s30 = sphi %s2429_s30, %s3399_s30   ;;  %s2372_s29 = sphi %s2427_s29, %s3398_s29   ;;  %s2368_s28 = sphi %s2425_s28, %s3397_s28   ;;  %s2364_s27 = sphi %s2423_s27, %s3396_s27  }
   0x7   : > { %s2448_s11 = sadd.s32 1, %s2376_s30   ;;  %s207_s12 = sadd.s32 1, %s2372_s29 }
   0x8   : > { %s204_s13 = ssub.s32 %s2376_s30, %s2448_s11  ;;  %p217_p0 = scmp.ne.s32.totalorder %s2372_s29, %s2368_s28 }
   0x9   : > { %p205_p1 = scmp.eq.s32.totalorder %s204_s13, 0  ;;  %p218_p2 = scmp.eq.s32.totalorder %s2444_s9, 1 }
   0xa   : > { %p223_p3 = scmp.ne.s32.totalorder %s2368_s28, %s2364_s27  ;;  %p224_p4 = scmp.eq.s32.totalorder %s2128_s10, 1 }
   0xb   : > { %s2459_s14 = scalar_select %p205_p1, %s2372_s29, %s207_s12  }
   0xc   : > { %p2461_p5 = por %p218_p2, %p217_p0  ;;  %p2465_p6 = por %p224_p4, %p223_p3 }
   0xd   : > { %p2131_p7 = scmp.ge.s32.totalorder %s2376_s30, 1  ;;  %p268_p8 = scmp.lt.s32.totalorder %s2376_s30, 3 }
   0xf   : > { %p269_p9 = pnand %p2131_p7, %p268_p8 }
  0x10   : > { %p307_p10 = scmp.lt.s32.totalorder (!%p269_p9), %s2444_s9, 1  ;;  %s3387_s0 = sld [smem:[#allocation5_spill]] (!%p269_p9) }
  0x11   : > { %272 = sbr.rel (%p269_p9) target bundleno = 1640 (0x668), region = 48  ;;  %s3388_s1 = sld [smem:[#allocation6_spill]] (!%p269_p9) }
  0x12   : > { %s304_s25 = sand.u32 (!%p269_p9), 1, %s2368_s28   ;;  %s2202_s12 = sshll.u32 (!%p269_p9), %s2444_s9, 1 }
  0x13   : > { %s3257_s26 = sshll.u32 (!%p269_p9), %s304_s25, 1  ;;  %s2039_s20 = scalar_lea.hbm (!%p269_p9), %s3381_s8, %s2202_s12 }
  0x14   : > { %s306_s10 = scalar_lea.vmem (!%p269_p9), [#allocation2], %s3257_s26  ;;  %s2043_s22 = sshll.u32 (!%p269_p9), %s2039_s20, 4  ;;  %s2044_s22 = int_to_ptr.hbm [resolvable:$true] %s2043_s22 }
  0x15   : > { %s2026_s23 = scalar_lea.sflag (!%p269_p9), [#allocation3], %s304_s25  ;;  %s2328_s24 = sshra.s32 (!%p269_p9), %s2044_s22, 4  ;;  %s2329_s24 = int_to_ptr.hbm [resolvable:$true] %s2328_s24 }
  0x16   : > { %s2473_s17 = scalar_select %p307_p10, %s2444_s9, 1  ;;  %vm333_vm0 = vcmask 261120  }
  0x17   : > { %v457_v24 = vld [vmem:[%s3388_s1 + $0x18] sm:$0xff]  ;;  %v456_v26 = vld [vmem:[%s3388_s1 + $0x10] sm:$0xff]  ;;  %v455_v29 = vld [vmem:[%s3388_s1 + $0x8] sm:$0xff]  ;;  %p2335_p0 = scmp.lt.s32.totalorder %s2329_s24, %s3381_s8 }
  0x18   : > { %s3382_s18 = sshll.u32 %s2473_s17, 6  ;;  %v494_v25 = vand.u32 4294901760, %v457_v24  ;;  %v496_v28 = vand.u32 4294901760, %v456_v26  ;;  %v498_v32 = vand.u32 4294901760, %v455_v29  ;;  %v454_v33 = vld [vmem:[%s3388_s1] sm:$0xff]  ;;  %s2334_s1 = scalar_lea.hbm %s3381_s8, 4 }
  0x19   : > { %s311_s21 = scalar_lea.vmem %s3387_s0, %s3382_s18  ;;  %v500_v37 = vand.u32 4294901760, %v454_v33  ;;  %s2330_s18 = scalar_lea.hbm %s2329_s24, 2 }
  0x1a   : > { %v2481_v0 = vld [vmem:[%s311_s21 + $0x10] sm:$0xff]  ;;  %v2483_v1 = vld [vmem:[%s311_s21] sm:$0xff]  ;;  %v2491_v5 = vld [vmem:[%s311_s21 + $0x18] sm:$0xff]  ;;  %v580_v27 = vsub.f32 %v457_v24, %v494_v25  ;;  %714 = vmatpush.msra.mxu3 %v494_v25  ;;  %495 = vmatpush.msra.mxu0 %v494_v25  ;;  %v586_v31 = vsub.f32 %v456_v26, %v496_v28  ;;  %v592_v36 = vsub.f32 %v455_v29, %v498_v32  ;;  %p2331_p11 = scmp.ne.s32.totalorder %s2329_s24, %s2330_s18  ;;  %p2336_p1 = scmp.lt.s32.totalorder %s2334_s1, %s2330_s18 }
  0x1b   : > { %v327_v2 = vmul.f32 %v2481_v0, %v2481_v0  ;;  %v325_v3 = vmul.f32 %v2483_v1, %v2483_v1  ;;  %v2489_v4 = vld [vmem:[%s311_s21 + $0x20] sm:$0xff]  ;;  %v2493_v6 = vld [vmem:[%s311_s21 + $0x8] sm:$0xff]  ;;  %v328_v12 = vmul.f32 %v2491_v5, %v2491_v5  ;;  %v2511_v18 = vld [vmem:[%s311_s21 + $0x30] sm:$0xff]  ;;  %v598_v41 = vsub.f32 %v454_v33, %v500_v37 }
  0x1c   : > { %v329_v7 = vmul.f32 %v2489_v4, %v2489_v4  ;;  %v2499_v10 = vld [vmem:[%s311_s21 + $0x28] sm:$0xff]  ;;  %v326_v13 = vmul.f32 %v2493_v6, %v2493_v6  ;;  %v2513_v19 = vld [vmem:[%s311_s21 + $0x38] sm:$0xff]  ;;  %v331_v20 = vmul.f32 %v2511_v18, %v2511_v18  ;;  %v581_v30 = vand.u32 4294901760, %v580_v27  ;;  %650 = vmatpush.msra.mxu2 %v580_v27  ;;  %716 = vmatpush.msra.mxu3 %v496_v28  ;;  %s2041_s21 = sshll.u32 %s306_s10, 4  ;;  %p2332_p12 = pnand %p2331_p11, %p2461_p5  ;;  %s2042_s21 = int_to_ptr.vmem [resolvable:$true] %s2041_s21 }
  0x1d   : > { %v340_v8 = vsel %vm333_vm0, %v327_v2, 0.0  ;;  %v334_v9 = vsel %vm333_vm0, %v325_v3, 0.0  ;;  %v330_v14 = vmul.f32 %v2499_v10, %v2499_v10  ;;  %v343_v15 = vsel %vm333_vm0, %v328_v12, 0.0  ;;  %497 = vmatpush.msra.mxu0 %v496_v28  ;;  %p2337_p2 = por %p2336_p1, %p2335_p0 }
  0x1e   : > { %341 = vadd.xlane.f32.xlu1 %v340_v8  ;;  %335 = vadd.xlane.f32.xlu0 %v334_v9  ;;  %v346_v11 = vsel %vm333_vm0, %v329_v7, 0.0  ;;  %v337_v16 = vsel %vm333_vm0, %v326_v13, 0.0  ;;  %v332_v21 = vmul.f32 %v2513_v19, %v2513_v19  ;;  %v352_v22 = vsel %vm333_vm0, %v331_v20, 0.0  ;;  %p2333_p13 = pneg %p2332_p12 }
  0x1f   : > { %347 = vadd.xlane.f32.xlu2 %v346_v11  ;;  %v349_v17 = vsel %vm333_vm0, %v330_v14, 0.0  ;;  %v582_v34 = vsub.f32 %v580_v27, %v581_v30  ;;  %v587_v35 = vand.u32 4294901760, %v586_v31  ;;  %653 = vmatpush.msra.mxu2 %v586_v31  ;;  %v593_v40 = vand.u32 4294901760, %v592_v36 }
  0x20   : > { %v355_v23 = vsel %vm333_vm0, %v332_v21, 0.0  ;;  %718 = vmatpush.msra.mxu3 %v498_v32  ;;  %499 = vmatpush.msra.mxu0 %v498_v32  ;;  %v599_v44 = vand.u32 4294901760, %v598_v41  ;;  %p2338_p3 = pnand %p2337_p2, %p2333_p13 }
  0x21   : > { %v583_v38 = vand.u32 4294901760, %v582_v34  ;;  %v588_v39 = vsub.f32 %v586_v31, %v587_v35  ;;  %656 = vmatpush.msra.mxu2 %v592_v36  ;;  %v594_v43 = vsub.f32 %v592_v36, %v593_v40 }
  0x22   : > { %720 = vmatpush.msra.mxu3 %v500_v37  ;;  %501 = vmatpush.msra.mxu0 %v500_v37  ;;  %v600_v46 = vsub.f32 %v598_v41, %v599_v44 }
  0x23   : > { %584 = vmatpush.msra.mxu1 %v583_v38  ;;  %v589_v42 = vand.u32 4294901760, %v588_v39  ;;  %659 = vmatpush.msra.mxu2 %v598_v41  ;;  %v595_v45 = vand.u32 4294901760, %v594_v43 }
  0x24   : > { %785 = vmatpush.msrb.mxu0 %v581_v30  ;;  %v601_v47 = vand.u32 4294901760, %v600_v46 }
  0x25   : > { %590 = vmatpush.msra.mxu1 %v589_v42 }
  0x26   : > { %344 = vadd.xlane.f32.xlu1 %v343_v15  ;;  %338 = vadd.xlane.f32.xlu0 %v337_v16 }
  0x27   : > { %350 = vadd.xlane.f32.xlu2 %v349_v17  ;;  %789 = vmatpush.msrb.mxu0 %v587_v35 }
  0x28   : > { %596 = vmatpush.msra.mxu1 %v595_v45 }
  0x29   : > { %793 = vmatpush.msrb.mxu0 %v593_v40 }
  0x2a   : > { %602 = vmatpush.msra.mxu1 %v601_v47 }
  0x2b   : > { %797 = vmatpush.msrb.mxu0 %v599_v44 }
  0x2c   : > { %844 = vmatpush.msrb.mxu1 %v494_v25 }
  0x2e   : > { %353 = vadd.xlane.f32.xlu0 %v352_v22  ;;  %356 = vadd.xlane.f32.xlu1 %v355_v23 }
  0x2f   : > { %846 = vmatpush.msrb.mxu1 %v496_v28 }
  0x31   : > { %848 = vmatpush.msrb.mxu1 %v498_v32 }
  0x33   : > { %850 = vmatpush.msrb.mxu1 %v500_v37 }
  0x91   : > { %v342_v48 = vpop.xlane.xlu1 %341  ;;  %v336_v49 = vpop.xlane.xlu0 %335 }
  0x92   : > { %v360_v50 = vmax.f32 %v342_v48, 1e-24  ;;  %v358_v51 = vmax.f32 %v336_v49, 1e-24  ;;  %v348_v52 = vpop.xlane.xlu2 %347 }
  0x93   : > { %v2533_v53 = vmax.f32 %v348_v52, 1e-24 }
  0x94   : > { %2246 = vrsqrt.f32 %v360_v50  ;;  %vm392_vm1 = vweird.f32 %v360_v50  ;;  %vm372_vm5 = vweird.f32 %v358_v51 }
  0x95   : > { %2248 = vrsqrt.f32 %v358_v51  ;;  %vm412_vm13 = vweird.f32 %v2533_v53 }
  0x96   : > { %2250 = vrsqrt.f32 %v2533_v53 }
  0x99   : > { %v345_v54 = vpop.xlane.xlu1 %344  ;;  %v339_v55 = vpop.xlane.xlu0 %338 }
  0x9a   : > { %v2247_v56 = vpop.eup %2246  ;;  %v361_v57 = vmax.f32 %v345_v54, 1e-24  ;;  %v359_v58 = vmax.f32 %v339_v55, 1e-24  ;;  %v351_v62 = vpop.xlane.xlu2 %350 }
  0x9b   : > { %v2249_v59 = vpop.eup %2248  ;;  %v387_v60 = vmul.f32 %v2247_v56, %v360_v50  ;;  %v2536_v7 = vmax.f32 %v351_v62, 1e-24  ;;  %vm393_vm2 = vweird.f32 %v2247_v56 }
  0x9c   : > { %v367_v61 = vmul.f32 %v2249_v59, %v358_v51  ;;  %2252 = vrsqrt.f32 %v361_v57  ;;  %v2538_v8 = vpop.eup %2250  ;;  %vm373_vm3 = vweird.f32 %v2249_v59  ;;  %vm2543_vm4 = vmor %vm392_vm1, %vm393_vm2  ;;  %vm402_vm7 = vweird.f32 %v361_v57 }
  0x9d   : > { %v388_v63 = vmul.f32 %v2247_v56, %v387_v60  ;;  %2254 = vrsqrt.f32 %v359_v58  ;;  %v407_v16 = vmul.f32 %v2538_v8, %v2533_v53  ;;  %vm374_vm6 = vmor %vm372_vm5, %vm373_vm3  ;;  %vm382_vm10 = vweird.f32 %v359_v58 }
  0x9e   : > { %v368_v2 = vmul.f32 %v2249_v59, %v367_v61  ;;  %2256 = vrsqrt.f32 %v2536_v7  ;;  %vm413_vm14 = vweird.f32 %v2538_v8  ;;  %vm422_vm1 = vweird.f32 %v2536_v7 }
  0x9f   : > { %v389_v3 = vmul.f32 0.5, %v388_v63  ;;  %v408_v29 = vmul.f32 %v2538_v8, %v407_v16  ;;  %vm2602_vm15 = vmor %vm412_vm13, %vm413_vm14 }
  0xa0   : > { %v369_v9 = vmul.f32 0.5, %v368_v2 }
  0xa1   : > { %v390_v11 = vsub.f32 1.5, %v389_v3  ;;  %v354_v23 = vpop.xlane.xlu0 %353  ;;  %v409_v38 = vmul.f32 0.5, %v408_v29  ;;  %v357_v44 = vpop.xlane.xlu1 %356 }
  0xa2   : > { %v2253_v12 = vpop.eup %2252  ;;  %v370_v13 = vsub.f32 1.5, %v369_v9  ;;  %v2551_v30 = vmax.f32 %v354_v23, 1e-24  ;;  %v2576_v47 = vmax.f32 %v357_v44, 1e-24 }
  0xa3   : > { %v2255_v14 = vpop.eup %2254  ;;  %v397_v15 = vmul.f32 %v2253_v12, %v361_v57  ;;  %v391_v17 = vmul.f32 %v2247_v56, %v390_v11  ;;  %vm403_vm8 = vweird.f32 %v2253_v12  ;;  %v410_v50 = vsub.f32 1.5, %v409_v38 }
  0xa4   : > { %v371_v21 = vmul.f32 %v2249_v59, %v370_v13  ;;  %v377_v22 = vmul.f32 %v2255_v14, %v359_v58  ;;  %v2555_v33 = vpop.eup %2256  ;;  %vm383_vm9 = vweird.f32 %v2255_v14  ;;  %2258 = vrsqrt.f32 %v2551_v30  ;;  %vm2565_vm11 = vmor %vm402_vm7, %vm403_vm8 }
  0xa5   : > { %v398_v24 = vmul.f32 %v2253_v12, %v397_v15  ;;  %v395_v31 = vsel %vm2543_vm4, %v2247_v56, %v391_v17  ;;  %v417_v42 = vmul.f32 %v2555_v33, %v2536_v7  ;;  %vm384_vm12 = vmor %vm382_vm10, %vm383_vm9  ;;  %2260 = vrsqrt.f32 %v2576_v47 }
  0xa6   : > { %v375_v25 = vsel %vm374_vm6, %v2249_v59, %v371_v21  ;;  %v378_v26 = vmul.f32 %v2255_v14, %v377_v22  ;;  %v2562_v37 = vmul.f32 %v395_v31, %v2481_v0  ;;  %v411_v59 = vmul.f32 %v2538_v8, %v410_v50 }
  0xa7   : > { %v2548_v27 = vmul.f32 %v375_v25, %v2483_v1  ;;  %v399_v28 = vmul.f32 0.5, %v398_v24  ;;  %v418_v51 = vmul.f32 %v2555_v33, %v417_v42  ;;  %vm423_vm2 = vweird.f32 %v2555_v33 }
  0xa8   : > { %v379_v32 = vmul.f32 0.5, %v378_v26  ;;  %v465_v48 = vsel %vm333_vm0, %v2562_v37, 0  ;;  %v415_v3 = vsel %vm2602_vm15, %v2538_v8, %v411_v59  ;;  %vm424_vm3 = vmor %vm422_vm1, %vm423_vm2  ;;  %vm432_vm4 = vweird.f32 %v2551_v30 }
  0xa9   : > { %v400_v34 = vsub.f32 1.5, %v399_v28  ;;  %v459_v35 = vsel %vm333_vm0, %v2548_v27, 0  ;;  %v2591_v57 = vand.u32 4294901760, %v465_v48  ;;  %v419_v60 = vmul.f32 0.5, %v418_v51 }
  0xaa   : > { %v380_v36 = vsub.f32 1.5, %v379_v32  ;;  %v2559_v1 = vand.u32 4294901760, %v459_v35  ;;  %v2583_v54 = vpop.eup %2258  ;;  %v2618_v17 = vmul.f32 %v415_v3, %v2489_v4  ;;  %vm442_vm7 = vweird.f32 %v2576_v47  ;;  %v1113_v3 = vld [vmem:[%s3379_s6 + $0x10] sm:$0xff] }
  0xab   : > { %v401_v39 = vmul.f32 %v2253_v12, %v400_v34  ;;  %v427_v53 = vmul.f32 %v2583_v54, %v2551_v30  ;;  %v519_v63 = vsub.f32 %v465_v48, %v2591_v57  ;;  %v420_v9 = vsub.f32 1.5, %v419_v60  ;;  %v2261_v13 = vpop.eup %2260 }
  0xac   : > { %v381_v41 = vmul.f32 %v2255_v14, %v380_v36  ;;  %604 = vmatmul.f32.vlgmr.msra.gmra.mxu1 %v2559_v1  ;;  %v503_v43 = vsub.f32 %v459_v35, %v2559_v1  ;;  %v437_v21 = vmul.f32 %v2261_v13, %v2576_v47  ;;  %v471_v23 = vsel %vm333_vm0, %v2618_v17, 0 }
  0xad   : > { %v405_v49 = vsel %vm2565_vm11, %v2253_v12, %v401_v39  ;;  %v428_v11 = vmul.f32 %v2583_v54, %v427_v53  ;;  %v520_v15 = vand.u32 4294901760, %v519_v63  ;;  %v421_v20 = vmul.f32 %v2555_v33, %v420_v9  ;;  %v1111_v9 = vld [vmem:[%s3379_s6] sm:$0xff] }
  0xae   : > { %v385_v0 = vsel %vm384_vm12, %v2255_v14, %v381_v41  ;;  %662 = vmatmul.f32.vlgmr.msra.gmra.mxu2 %v503_v43  ;;  %v504_v45 = vand.u32 4294901760, %v503_v43  ;;  %v2594_v58 = vmul.f32 %v405_v49, %v2491_v5  ;;  %v438_v25 = vmul.f32 %v2261_v13, %v437_v21 }
  0xaf   : > { %v2574_v46 = vmul.f32 %v385_v0, %v2493_v6  ;;  %v429_v8 = vmul.f32 0.5, %v428_v11  ;;  %v521_v7 = vsub.f32 %v519_v63, %v520_v15  ;;  %v425_v24 = vsel %vm424_vm3, %v2555_v33, %v421_v20 }
  0xb0   : > { %724 = vmatmul.f32.vlgmr.msra.gmra.mxu3 %v504_v45  ;;  %v505_v52 = vsub.f32 %v503_v43, %v504_v45  ;;  %v468_v2 = vsel %vm333_vm0, %v2594_v58, 0  ;;  %vm433_vm5 = vweird.f32 %v2583_v54  ;;  %v2629_v29 = vand.u32 4294901760, %v471_v23 }
  0xb1   : > { %v462_v6 = vsel %vm333_vm0, %v2574_v46, 0  ;;  %v2615_v16 = vand.u32 4294901760, %v468_v2  ;;  %v430_v4 = vsub.f32 1.5, %v429_v8  ;;  %v522_v26 = vand.u32 4294901760, %v521_v7  ;;  %vm434_vm6 = vmor %vm432_vm4, %vm433_vm5 }
  0xb2   : > { %v506_v55 = vand.u32 4294901760, %v505_v52  ;;  %v2589_v56 = vand.u32 4294901760, %v462_v6  ;;  %v2632_v31 = vmul.f32 %v425_v24, %v2499_v10  ;;  %v439_v34 = vmul.f32 0.5, %v438_v25 }
  0xb3   : > { %v527_v22 = vsub.f32 %v468_v2, %v2615_v16  ;;  %v431_v32 = vmul.f32 %v2583_v54, %v430_v4  ;;  %v535_v30 = vsub.f32 %v471_v23, %v2629_v29  ;;  %vm443_vm8 = vweird.f32 %v2261_v13  ;;  %v1115_v2 = vld [vmem:[%s3379_s6 + $0x20] sm:$0xff] }
  0xb4   : > { %507 = vmatmul.f32.vlgmr.msra.gmra.mxu0 %v506_v55  ;;  %608 = vmatmul.f32.gmra.mxu1 %v2589_v56  ;;  %v511_v61 = vsub.f32 %v462_v6, %v2589_v56  ;;  %v474_v35 = vsel %vm333_vm0, %v2632_v31, 0  ;;  %v440_v38 = vsub.f32 1.5, %v439_v34  ;;  %vm444_vm9 = vmor %vm442_vm7, %vm443_vm8  ;;  %vm884_vm10 = vcmask 64512  }
  0xb5   : > { %v528_v28 = vand.u32 4294901760, %v527_v22  ;;  %v435_v36 = vsel %vm434_vm6, %v2583_v54, %v431_v32  ;;  %v536_v39 = vand.u32 4294901760, %v535_v30  ;;  %v2641_v40 = vand.u32 4294901760, %v474_v35 }
  0xb6   : > { %667 = vmatmul.f32.gmra.mxu2 %v511_v61  ;;  %v512_v5 = vand.u32 4294901760, %v511_v61  ;;  %v2644_v41 = vmul.f32 %v435_v36, %v2511_v18  ;;  %v441_v42 = vmul.f32 %v2261_v13, %v440_v38 }
  0xb7   : > { %v529_v33 = vsub.f32 %v527_v22, %v528_v28  ;;  %v537_v43 = vsub.f32 %v535_v30, %v536_v39  ;;  %v543_v44 = vsub.f32 %v474_v35, %v2641_v40 }
  0xb8   : > { %730 = vmatmul.f32.gmra.mxu3 %v512_v5  ;;  %v513_v12 = vsub.f32 %v511_v61, %v512_v5  ;;  %v477_v0 = vsel %vm333_vm0, %v2644_v41, 0  ;;  %v445_v45 = vsel %vm444_vm9, %v2261_v13, %v441_v42  ;;  %v1118_v5 = vld [vmem:[%s3379_s6 + $0x38] sm:$0xff] }
  0xb9   : > { %v530_v10 = vand.u32 4294901760, %v529_v33  ;;  %v538_v47 = vand.u32 4294901760, %v537_v43  ;;  %v544_v48 = vand.u32 4294901760, %v543_v44  ;;  %v550_v49 = vand.u32 4294901760, %v477_v0  ;;  %1279 = vmatpush.msra.mxu1 %v1118_v5 }
  0xba   : > { %v514_v14 = vand.u32 4294901760, %v513_v12  ;;  %v2651_v18 = vmul.f32 %v445_v45, %v2513_v19 }
  0xbb   : > { %v545_v50 = vsub.f32 %v543_v44, %v544_v48  ;;  %v551_v51 = vsub.f32 %v477_v0, %v550_v49 }
  0xbc   : > { %515 = vmatmul.f32.gmra.mxu0 %v514_v14  ;;  %612 = vmatmul.f32.gmra.mxu1 %v2591_v57  ;;  %v480_v52 = vsel %vm333_vm0, %v2651_v18, 0 }
  0xbd   : > { %v546_v54 = vand.u32 4294901760, %v545_v50  ;;  %v552_v6 = vand.u32 4294901760, %v551_v51  ;;  %v558_v55 = vand.u32 4294901760, %v480_v52 }
  0xbe   : > { %672 = vmatmul.f32.gmra.mxu2 %v519_v63  ;;  %v1116_v63 = vld [vmem:[%s3379_s6 + $0x28] sm:$0xff] }
  0xbf   : > { %v553_v59 = vsub.f32 %v551_v51, %v552_v6  ;;  %v559_v60 = vsub.f32 %v480_v52, %v558_v55  ;;  %1280 = vmatpush.msra.mxu1 %v1116_v63 }
  0xc0   : > { %736 = vmatmul.f32.gmra.mxu3 %v520_v15 }
  0xc1   : > { %v554_v19 = vand.u32 4294901760, %v553_v59  ;;  %v560_v53 = vand.u32 4294901760, %v559_v60 }
  0xc3   : > { %v561_v61 = vsub.f32 %v559_v60, %v560_v53 }
  0xc4   : > { %523 = vmatmul.f32.gmra.mxu0 %v522_v26  ;;  %616 = vmatmul.f32.gmra.mxu1 %v2615_v16 }
  0xc5   : > { %v562_v62 = vand.u32 4294901760, %v561_v61 }
  0xc6   : > { %677 = vmatmul.f32.gmra.mxu2 %v527_v22 }
  0xc8   : > { %742 = vmatmul.f32.gmra.mxu3 %v528_v28 }
  0xcc   : > { %531 = vmatmul.f32.gmra.mxu0 %v530_v10  ;;  %620 = vmatmul.f32.gmra.mxu1 %v2629_v29 }
  0xce   : > { %682 = vmatmul.f32.gmra.mxu2 %v535_v30 }
  0xd0   : > { %748 = vmatmul.f32.gmra.mxu3 %v536_v39 }
  0xd4   : > { %539 = vmatmul.f32.gmra.mxu0 %v538_v47  ;;  %624 = vmatmul.f32.gmra.mxu1 %v2641_v40 }
  0xd6   : > { %687 = vmatmul.f32.gmra.mxu2 %v543_v44 }
  0xd8   : > { %754 = vmatmul.f32.gmra.mxu3 %v544_v48 }
  0xdc   : > { %547 = vmatmul.f32.gmra.mxu0 %v546_v54  ;;  %628 = vmatmul.f32.gmra.mxu1 %v550_v49 }
  0xde   : > { %692 = vmatmul.f32.gmra.mxu2 %v551_v51 }
  0xe0   : > { %760 = vmatmul.f32.gmra.mxu3 %v552_v6 }
  0xe4   : > { %555 = vmatmul.f32.gmra.mxu0 %v554_v19  ;;  %632 = vmatmul.f32.gmra.mxu1 %v558_v55 }
  0xe6   : > { %697 = vmatmul.f32.gmra.mxu2 %v559_v60 }
  0xe8   : > { %766 = vmatmul.f32.gmra.mxu3 %v560_v53 }
  0xec   : > { %563 = vmatmul.f32.gmra.mxu0 %v562_v62  ;;  %852 = vmatmul.f32.vlgmr.msrb.gmra.mxu1 %v2559_v1 }
  0xf4   : > { %799 = vmatmul.f32.vlgmr.msrb.gmra.mxu0 %v2559_v1  ;;  %856 = vmatmul.f32.gmra.mxu1 %v2589_v56  ;;  %v1114_v1 = vld [vmem:[%s3379_s6 + $0x18] sm:$0xff] }
  0xf5   : > { %1281 = vmatpush.msra.mxu1 %v1114_v1 }
  0xfc   : > { %803 = vmatmul.f32.gmra.mxu0 %v2589_v56  ;;  %860 = vmatmul.f32.gmra.mxu1 %v2591_v57  ;;  %v1112_v56 = vld [vmem:[%s3379_s6 + $0x8] sm:$0xff] }
  0xfd   : > { %1282 = vmatpush.msra.mxu1 %v1112_v56 }
 0x104   : > { %807 = vmatmul.f32.gmra.mxu0 %v2591_v57  ;;  %864 = vmatmul.f32.gmra.mxu1 %v2615_v16  ;;  %v1117_v57 = vld [vmem:[%s3379_s6 + $0x30] sm:$0xff] }
 0x105   : > { %1238 = vmatpush.msra.mxu0 %v1117_v57 }
 0x107   : > { %1239 = vmatpush.msra.mxu0 %v1115_v2 }
 0x109   : > { %1240 = vmatpush.msra.mxu0 %v1113_v3 }
 0x10b   : > { %1241 = vmatpush.msra.mxu0 %v1111_v9 }
 0x10c   : > { %811 = vmatmul.f32.gmra.mxu0 %v2615_v16  ;;  %868 = vmatmul.f32.gmra.mxu1 %v2629_v29 }
 0x114   : > { %815 = vmatmul.f32.gmra.mxu0 %v2629_v29  ;;  %872 = vmatmul.f32.gmra.mxu1 %v2641_v40 }
 0x11c   : > { %819 = vmatmul.f32.gmra.mxu0 %v2641_v40  ;;  %876 = vmatmul.f32.gmra.mxu1 %v550_v49 }
 0x124   : > { %823 = vmatmul.f32.gmra.mxu0 %v550_v49  ;;  %880 = vmatmul.f32.gmra.mxu1 %v558_v55 }
 0x129   : > { %v605_v11 = vpop.f32.mrf.mxu1 }
 0x12c   : > { %827 = vmatmul.f32.gmra.mxu0 %v558_v55  ;;  %2161 = vmatmul.msk.f32.vlgmr.msra.gmra.mxu1 %vm333_vm0, %v2548_v27 }
 0x131   : > { %v508_v12 = vpop.f32.mrf.mxu0  ;;  %v609_v13 = vpop.f32.mrf.mxu1 }
 0x132   : > { %v663_v22 = vpop.f32.mrf.mxu2  ;;  %v606_v4 = vadd.f32 %v605_v11, %v508_v12 }
 0x134   : > { %2153 = vmatmul.msk.f32.vlgmr.msra.gmra.mxu0 %vm333_vm0, %v2548_v27  ;;  %2162 = vmatmul.msk.f32.gmra.mxu1 %vm333_vm0, %v2574_v46  ;;  %v664_v29 = vadd.f32 %v663_v22, %v606_v4 }
 0x139   : > { %v516_v14 = vpop.f32.mrf.mxu0  ;;  %v613_v15 = vpop.f32.mrf.mxu1 }
 0x13a   : > { %v610_v32 = vadd.f32 %v609_v13, %v516_v14 }
 0x13c   : > { %2154 = vmatmul.msk.f32.gmra.mxu0 %vm333_vm0, %v2574_v46  ;;  %2163 = vmatmul.msk.f32.gmra.mxu1 %vm333_vm0, %v2562_v37 }
 0x141   : > { %v524_v16 = vpop.f32.mrf.mxu0  ;;  %v617_v20 = vpop.f32.mrf.mxu1 }
 0x144   : > { %2155 = vmatmul.msk.f32.gmra.mxu0 %vm333_vm0, %v2562_v37  ;;  %2164 = vmatmul.msk.f32.gmra.mxu1 %vm333_vm0, %v2594_v58 }
 0x149   : > { %v532_v27 = vpop.f32.mrf.mxu0  ;;  %v621_v8 = vpop.f32.mrf.mxu1 }
 0x14a   : > { %v618_v50 = vadd.f32 %v617_v20, %v532_v27 }
 0x14c   : > { %2156 = vmatmul.msk.f32.gmra.mxu0 %vm333_vm0, %v2594_v58  ;;  %2165 = vmatmul.msk.f32.gmra.mxu1 %vm333_vm0, %v2618_v17  ;;  %v725_v58 = vpop.f32.mrf.mxu3 }
 0x151   : > { %v540_v46 = vpop.f32.mrf.mxu0  ;;  %v2710_v21 = vpop.f32.mrf.mxu1 }
 0x152   : > { %v622_v53 = vadd.f32 %v621_v8, %v540_v46 }
 0x154   : > { %2157 = vmatmul.msk.f32.gmra.mxu0 %vm333_vm0, %v2618_v17  ;;  %2166 = vmatmul.msk.f32.gmra.mxu1 %vm333_vm0, %v2632_v31  ;;  %v668_v17 = vpop.f32.mrf.mxu2  ;;  %v731_v28 = vpop.f32.mrf.mxu3 }
 0x155   : > { %v669_v36 = vadd.f32 %v668_v17, %v610_v32 }
 0x157   : > { %v732_v40 = vadd.f32 %v731_v28, %v669_v36 }
 0x159   : > { %v548_v37 = vpop.f32.mrf.mxu0  ;;  %v2716_v7 = vpop.f32.mrf.mxu1 }
 0x15a   : > { %v626_v9 = vadd.f32 %v2710_v21, %v548_v37 }
 0x15c   : > { %2158 = vmatmul.msk.f32.gmra.mxu0 %vm333_vm0, %v2632_v31  ;;  %2167 = vmatmul.msk.f32.gmra.mxu1 %vm333_vm0, %v2644_v41  ;;  %v726_v31 = vadd.f32 %v725_v58, %v664_v29  ;;  %v673_v34 = vpop.f32.mrf.mxu2  ;;  %v737_v10 = vpop.f32.mrf.mxu3 }
 0x161   : > { %v2722_v23 = vpop.f32.mrf.mxu0  ;;  %v2724_v24 = vpop.f32.mrf.mxu1 }
 0x162   : > { %v630_v8 = vadd.f32 %v2716_v7, %v2722_v23 }
 0x164   : > { %2159 = vmatmul.msk.f32.gmra.mxu0 %vm333_vm0, %v2644_v41  ;;  %2168 = vmatmul.msk.f32.gmra.mxu1 %vm333_vm0, %v2651_v18  ;;  %v614_v41 = vadd.f32 %v613_v15, %v524_v16  ;;  %v678_v0 = vpop.f32.mrf.mxu2  ;;  %v743_v49 = vpop.f32.mrf.mxu3 }
 0x165   : > { %v679_v6 = vadd.f32 %v678_v0, %v618_v50 }
 0x166   : > { %v674_v45 = vadd.f32 %v673_v34, %v614_v41 }
 0x167   : > { %v744_v19 = vadd.f32 %v743_v49, %v679_v6 }
 0x169   : > { %v2730_v25 = vpop.f32.mrf.mxu0  ;;  %v853_v26 = vpop.f32.mrf.mxu1 }
 0x16a   : > { %v634_v28 = vadd.f32 %v2724_v24, %v2730_v25 }
 0x16c   : > { %2160 = vmatmul.msk.f32.gmra.mxu0 %vm333_vm0, %v2651_v18  ;;  %v738_v18 = vadd.f32 %v737_v10, %v674_v45  ;;  %v683_v59 = vpop.f32.mrf.mxu2  ;;  %v749_v61 = vpop.f32.mrf.mxu3 }
 0x16d   : > { %v684_v63 = vadd.f32 %v683_v59, %v622_v53 }
 0x16f   : > { %v750_v3 = vadd.f32 %v749_v61, %v684_v63 }
 0x171   : > { %v800_v33 = vpop.f32.mrf.mxu0  ;;  %v857_v30 = vpop.f32.mrf.mxu1 }
 0x172   : > { %v801_v35 = vadd.f32 %v800_v33, %v726_v31 }
 0x174   : > { %v2734_v38 = vadd.f32 %v853_v26, %v801_v35  ;;  %v688_v2 = vpop.f32.mrf.mxu2  ;;  %v755_v13 = vpop.f32.mrf.mxu3 }
 0x175   : > { %v689_v14 = vadd.f32 %v688_v2, %v626_v9 }
 0x176   : > { %v885_v39 = vsel %vm884_vm10, %v2734_v38, -inf }
 0x177   : > { %886 = vmax.xlane.f32.xlu2 %v885_v39  ;;  %v756_v27 = vadd.f32 %v755_v13, %v689_v14 }
 0x179   : > { %v804_v42 = vpop.f32.mrf.mxu0  ;;  %v861_v43 = vpop.f32.mrf.mxu1 }
 0x17a   : > { %v805_v44 = vadd.f32 %v804_v42, %v732_v40 }
 0x17c   : > { %v2738_v47 = vadd.f32 %v857_v30, %v805_v44  ;;  %v693_v46 = vpop.f32.mrf.mxu2  ;;  %v761_v21 = vpop.f32.mrf.mxu3 }
 0x17d   : > { %v694_v17 = vadd.f32 %v693_v46, %v630_v8 }
 0x17e   : > { %v888_v48 = vsel %vm884_vm10, %v2738_v47, -inf }
 0x17f   : > { %889 = vmax.xlane.f32.xlu0 %v888_v48  ;;  %v762_v26 = vadd.f32 %v761_v21, %v694_v17 }
 0x181   : > { %v808_v51 = vpop.f32.mrf.mxu0  ;;  %v865_v54 = vpop.f32.mrf.mxu1 }
 0x182   : > { %v809_v52 = vadd.f32 %v808_v51, %v738_v18 }
 0x184   : > { %v2742_v55 = vadd.f32 %v861_v43, %v809_v52  ;;  %v698_v34 = vpop.f32.mrf.mxu2  ;;  %v767_v30 = vpop.f32.mrf.mxu3 }
 0x185   : > { %v699_v7 = vadd.f32 %v698_v34, %v634_v28 }
 0x186   : > { %v891_v60 = vsel %vm884_vm10, %v2742_v55, -inf }
 0x187   : > { %892 = vmax.xlane.f32.xlu1 %v891_v60  ;;  %v768_v35 = vadd.f32 %v767_v30, %v699_v7 }
 0x189   : > { %v812_v62 = vpop.f32.mrf.mxu0  ;;  %v869_v56 = vpop.f32.mrf.mxu1 }
 0x18a   : > { %v813_v5 = vadd.f32 %v812_v62, %v744_v19  ;;  %v2785_v62 = vld [vmem:[%s3377_s4 + $0x8] sm:$0xff] }
 0x18b   : > { %1200 = vmatpush.msrb.mxu3 %v2785_v62 }
 0x18c   : > { %v2746_v1 = vadd.f32 %v865_v54, %v813_v5  ;;  %v2790_v5 = vld [vmem:[%s3377_s4] sm:$0xff] }
 0x18d   : > { %1159 = vmatpush.msrb.mxu2 %v2790_v5  ;;  %1389 = vmatpush.msra.mxu3 %v2790_v5 }
 0x18e   : > { %v894_v57 = vsel %vm884_vm10, %v2746_v1, -inf  ;;  %1683 = vmatpush.msrb.mxu1 %v2790_v5 }
 0x18f   : > { %895 = vmax.xlane.f32.xlu2 %v894_v57 }
 0x190   : > { %1887 = vmatpush.msra.mxu1 %v2790_v5 }
 0x191   : > { %v816_v11 = vpop.f32.mrf.mxu0  ;;  %v873_v20 = vpop.f32.mrf.mxu1 }
 0x192   : > { %v817_v12 = vadd.f32 %v816_v11, %v750_v3 }
 0x194   : > { %v870_v15 = vadd.f32 %v869_v56, %v817_v12 }
 0x196   : > { %v897_v16 = vsel %vm884_vm10, %v870_v15, -inf }
 0x197   : > { %898 = vmax.xlane.f32.xlu0 %v897_v16 }
 0x199   : > { %v820_v22 = vpop.f32.mrf.mxu0  ;;  %v877_v29 = vpop.f32.mrf.mxu1 }
 0x19a   : > { %v821_v58 = vadd.f32 %v820_v22, %v756_v27 }
 0x19c   : > { %v2754_v4 = vadd.f32 %v873_v20, %v821_v58 }
 0x19e   : > { %v900_v37 = vsel %vm884_vm10, %v2754_v4, -inf }
 0x19f   : > { %901 = vmax.xlane.f32.xlu1 %v900_v37 }
 0x1a1   : > { %v824_v31 = vpop.f32.mrf.mxu0  ;;  %v881_v39 = vpop.f32.mrf.mxu1 }
 0x1a2   : > { %v825_v32 = vadd.f32 %v824_v31, %v762_v26 }
 0x1a4   : > { %v878_v23 = vadd.f32 %v877_v29, %v825_v32 }
 0x1a6   : > { %v903_v33 = vsel %vm884_vm10, %v878_v23, -inf }
 0x1a7   : > { %904 = vmax.xlane.f32.xlu2 %v903_v33 }
 0x1a9   : > { %v828_v36 = vpop.f32.mrf.mxu0 }
 0x1aa   : > { %v829_v10 = vadd.f32 %v828_v36, %v768_v35 }
 0x1ac   : > { %v882_v40 = vadd.f32 %v881_v39, %v829_v10 }
 0x1ae   : > { %v906_v41 = vsel %vm884_vm10, %v882_v40, -inf }
 0x1af   : > { %907 = vmax.xlane.f32.xlu0 %v906_v41 }
 0x1ea   : > { %v887_v42 = vpop.xlane.xlu2 %886 }
 0x1eb   : > { %v909_v24 = vsub.f32 %v2734_v38, %v887_v42 }
 0x1ed   : > { %v917_v25 = vmul.f32 1.442695, %v909_v24 }
 0x1ef   : > { %2262 = vpow2.f32 %v917_v25 }
 0x1f2   : > { %v890_v43 = vpop.xlane.xlu0 %889 }
 0x1f3   : > { %v910_v44 = vsub.f32 %v2738_v47, %v890_v43 }
 0x1f5   : > { %v2764_v0 = vpop.eup %2262  ;;  %v919_v45 = vmul.f32 1.442695, %v910_v44 }
 0x1f6   : > { %v933_v48 = vsel %vm884_vm10, %v2764_v0, 0.0 }
 0x1f7   : > { %2264 = vpow2.f32 %v919_v45  ;;  %934 = vadd.xlane.f32.xlu1 %v933_v48 }
 0x1fa   : > { %v893_v49 = vpop.xlane.xlu1 %892 }
 0x1fb   : > { %v911_v18 = vsub.f32 %v2742_v55, %v893_v49 }
 0x1fd   : > { %v2769_v50 = vpop.eup %2264  ;;  %v921_v51 = vmul.f32 1.442695, %v911_v18 }
 0x1fe   : > { %v936_v38 = vsel %vm884_vm10, %v2769_v50, 0.0 }
 0x1ff   : > { %2266 = vpow2.f32 %v921_v51  ;;  %937 = vadd.xlane.f32.xlu2 %v936_v38 }
 0x202   : > { %v896_v47 = vpop.xlane.xlu2 %895 }
 0x203   : > { %v912_v52 = vsub.f32 %v2746_v1, %v896_v47 }
 0x205   : > { %v2774_v54 = vpop.eup %2266  ;;  %v923_v6 = vmul.f32 1.442695, %v912_v52 }
 0x206   : > { %v939_v59 = vsel %vm884_vm10, %v2774_v54, 0.0 }
 0x207   : > { %2268 = vpow2.f32 %v923_v6  ;;  %940 = vadd.xlane.f32.xlu0 %v939_v59 }
 0x20a   : > { %v899_v55 = vpop.xlane.xlu0 %898 }
 0x20b   : > { %v913_v60 = vsub.f32 %v870_v15, %v899_v55 }
 0x20d   : > { %v2778_v19 = vpop.eup %2268  ;;  %v925_v53 = vmul.f32 1.442695, %v913_v60 }
 0x20e   : > { %v942_v61 = vsel %vm884_vm10, %v2778_v19, 0.0 }
 0x20f   : > { %2270 = vpow2.f32 %v925_v53  ;;  %943 = vadd.xlane.f32.xlu1 %v942_v61 }
 0x212   : > { %v902_v63 = vpop.xlane.xlu1 %901 }
 0x213   : > { %v914_v1 = vsub.f32 %v2754_v4, %v902_v63 }
 0x215   : > { %v2798_v56 = vpop.eup %2270  ;;  %v927_v57 = vmul.f32 1.442695, %v914_v1 }
 0x216   : > { %v945_v2 = vsel %vm884_vm10, %v2798_v56, 0.0 }
 0x217   : > { %2272 = vpow2.f32 %v927_v57  ;;  %946 = vadd.xlane.f32.xlu2 %v945_v2 }
 0x21a   : > { %v905_v3 = vpop.xlane.xlu2 %904 }
 0x21b   : > { %v915_v9 = vsub.f32 %v878_v23, %v905_v3 }
 0x21d   : > { %v2802_v11 = vpop.eup %2272  ;;  %v929_v12 = vmul.f32 1.442695, %v915_v9 }
 0x21e   : > { %v948_v13 = vsel %vm884_vm10, %v2802_v11, 0.0 }
 0x21f   : > { %2274 = vpow2.f32 %v929_v12  ;;  %949 = vadd.xlane.f32.xlu0 %v948_v13 }
 0x222   : > { %v908_v14 = vpop.xlane.xlu0 %907 }
 0x223   : > { %v916_v15 = vsub.f32 %v882_v40, %v908_v14 }
 0x225   : > { %v2806_v16 = vpop.eup %2274  ;;  %v931_v20 = vmul.f32 1.442695, %v916_v15 }
 0x226   : > { %v951_v27 = vsel %vm884_vm10, %v2806_v16, 0.0 }
 0x227   : > { %2276 = vpow2.f32 %v931_v20  ;;  %952 = vadd.xlane.f32.xlu1 %v951_v27 }
 0x22d   : > { %v2810_v8 = vpop.eup %2276 }
 0x22e   : > { %v954_v46 = vsel %vm884_vm10, %v2810_v8, 0.0 }
 0x22f   : > { %955 = vadd.xlane.f32.xlu2 %v954_v46 }
 0x26a   : > { %v935_v22 = vpop.xlane.xlu1 %934 }
 0x26b   : > { %2278 = vrcp.f32 %v935_v22  ;;  %v968_v26 = vand.u32 2147483648, %v935_v22  ;;  %v966_v28 = vand.u32 2147483647, %v935_v22  ;;  %vm962_vm11 = vweird.f32 %v935_v22 }
 0x26d   : > { %v969_v32 = vor.u32 1.1754944e-38, %v968_v26  ;;  %vm967_vm13 = vcmp.eq.f32.partialorder %v966_v28, 8.507059e+37 }
 0x271   : > { %v2279_v58 = vpop.eup %2278 }
 0x272   : > { %v958_v17 = vmul.f32 %v2279_v58, %v935_v22  ;;  %v938_v4 = vpop.xlane.xlu2 %937  ;;  %vm963_vm0 = vweird.f32 %v2279_v58 }
 0x273   : > { %2280 = vrcp.f32 %v938_v4  ;;  %vm964_vm12 = vmor %vm962_vm11, %vm963_vm0  ;;  %v983_v10 = vand.u32 2147483648, %v938_v4  ;;  %v981_v39 = vand.u32 2147483647, %v938_v4  ;;  %vm977_vm15 = vweird.f32 %v938_v4 }
 0x274   : > { %v959_v21 = vsub.f32 1.0, %v958_v17 }
 0x275   : > { %v984_v42 = vor.u32 1.1754944e-38, %v983_v10  ;;  %vm982_vm2 = vcmp.eq.f32.partialorder %v981_v39, 8.507059e+37 }
 0x276   : > { %v960_v37 = vmul.f32 %v2279_v58, %v959_v21 }
 0x278   : > { %v961_v29 = vadd.f32 %v2279_v58, %v960_v37 }
 0x279   : > { %v2281_v31 = vpop.eup %2280 }
 0x27a   : > { %v973_v34 = vmul.f32 %v2281_v31, %v938_v4  ;;  %v941_v7 = vpop.xlane.xlu0 %940  ;;  %v965_v23 = vsel %vm964_vm12, %v2279_v58, %v961_v29  ;;  %vm978_vm14 = vweird.f32 %v2281_v31 }
 0x27b   : > { %2282 = vrcp.f32 %v941_v7  ;;  %v970_v30 = vsel %vm967_vm13, %v969_v32, %v965_v23  ;;  %vm979_vm1 = vmor %vm977_vm15, %vm978_vm14  ;;  %v998_v49 = vand.u32 2147483648, %v941_v7  ;;  %v996_v18 = vand.u32 2147483647, %v941_v7 }
 0x27c   : > { %v974_v33 = vsub.f32 1.0, %v973_v34  ;;  %v2815_v35 = vmul.f32 %v2764_v0, %v970_v30  ;;  %vm992_vm4 = vweird.f32 %v941_v7 }
 0x27d   : > { %v999_v47 = vor.u32 1.1754944e-38, %v998_v49  ;;  %vm997_vm6 = vcmp.eq.f32.partialorder %v996_v18, 8.507059e+37 }
 0x27e   : > { %v975_v36 = vmul.f32 %v2281_v31, %v974_v33  ;;  %2137 = vmatmul.msk.f32.vlgmr.msrb.gmra.mxu2 %vm884_vm10, %v2815_v35  ;;  %2145 = vmatmul.msk.f32.vlgmr.msrb.gmra.mxu3 %vm884_vm10, %v2815_v35 }
 0x27f   : > { %1409 = vmatpush.msrb.mxu3 %v2785_v62 }
 0x280   : > { %v976_v40 = vadd.f32 %v2281_v31, %v975_v36 }
 0x281   : > { %v2283_v41 = vpop.eup %2282 }
 0x282   : > { %v988_v24 = vmul.f32 %v2283_v41, %v941_v7  ;;  %v944_v25 = vpop.xlane.xlu1 %943  ;;  %v980_v43 = vsel %vm979_vm1, %v2281_v31, %v976_v40  ;;  %vm993_vm3 = vweird.f32 %v2283_v41 }
 0x283   : > { %2284 = vrcp.f32 %v944_v25  ;;  %v985_v0 = vsel %vm982_vm2, %v984_v42, %v980_v43  ;;  %vm994_vm5 = vmor %vm992_vm4, %vm993_vm3  ;;  %v1013_v61 = vand.u32 2147483648, %v944_v25  ;;  %v1011_v63 = vand.u32 2147483647, %v944_v25 }
 0x284   : > { %v989_v44 = vsub.f32 1.0, %v988_v24  ;;  %v2823_v45 = vmul.f32 %v2769_v50, %v985_v0  ;;  %vm1007_vm8 = vweird.f32 %v944_v25  ;;  %v1324_v43 = vsel %vm884_vm10, %v2815_v35, 0.0 }
 0x285   : > { %v1014_v2 = vor.u32 1.1754944e-38, %v1013_v61  ;;  %vm1012_vm0 = vcmp.eq.f32.partialorder %v1011_v63, 8.507059e+37 }
 0x286   : > { %v990_v48 = vmul.f32 %v2283_v41, %v989_v44  ;;  %2138 = vmatmul.msk.f32.gmra.mxu2 %vm884_vm10, %v2823_v45  ;;  %2146 = vmatmul.msk.f32.gmra.mxu3 %vm884_vm10, %v2823_v45  ;;  %v1325_v42 = vsel %vm884_vm10, %v2823_v45, 0.0 }
 0x287   : > { %v1326_v49 = vadd.f32 %v1325_v42, %v1324_v43 }
 0x288   : > { %v991_v51 = vadd.f32 %v2283_v41, %v990_v48 }
 0x289   : > { %v2285_v38 = vpop.eup %2284 }
 0x28a   : > { %v1003_v52 = vmul.f32 %v2285_v38, %v944_v25  ;;  %v947_v6 = vpop.xlane.xlu2 %946  ;;  %v995_v59 = vsel %vm994_vm5, %v2283_v41, %v991_v51  ;;  %vm1008_vm7 = vweird.f32 %v2285_v38 }
 0x28b   : > { %2286 = vrcp.f32 %v947_v6  ;;  %v1000_v55 = vsel %vm997_vm6, %v999_v47, %v995_v59  ;;  %vm1009_vm9 = vmor %vm1007_vm8, %vm1008_vm7  ;;  %v1028_v20 = vand.u32 2147483648, %v947_v6  ;;  %v1026_v27 = vand.u32 2147483647, %v947_v6 }
 0x28c   : > { %v1004_v50 = vsub.f32 1.0, %v1003_v52  ;;  %v2830_v60 = vmul.f32 %v2774_v54, %v1000_v55  ;;  %vm1022_vm12 = vweird.f32 %v947_v6 }
 0x28d   : > { %v1029_v58 = vor.u32 1.1754944e-38, %v1028_v20  ;;  %vm1027_vm14 = vcmp.eq.f32.partialorder %v1026_v27, 8.507059e+37 }
 0x28e   : > { %v1005_v53 = vmul.f32 %v2285_v38, %v1004_v50  ;;  %2139 = vmatmul.msk.f32.gmra.mxu2 %vm884_vm10, %v2830_v60  ;;  %2147 = vmatmul.msk.f32.gmra.mxu3 %vm884_vm10, %v2830_v60 }
 0x290   : > { %v1006_v1 = vadd.f32 %v2285_v38, %v1005_v53 }
 0x291   : > { %v2287_v57 = vpop.eup %2286 }
 0x292   : > { %v1018_v3 = vmul.f32 %v2287_v57, %v947_v6  ;;  %v950_v9 = vpop.xlane.xlu0 %949  ;;  %v1010_v12 = vsel %vm1009_vm9, %v2285_v38, %v1006_v1  ;;  %vm1023_vm11 = vweird.f32 %v2287_v57 }
 0x293   : > { %2288 = vrcp.f32 %v950_v9  ;;  %v1015_v13 = vsel %vm1012_vm0, %v1014_v2, %v1010_v12  ;;  %vm1024_vm13 = vmor %vm1022_vm12, %vm1023_vm11  ;;  %v1043_v29 = vand.u32 2147483648, %v950_v9  ;;  %v1041_v31 = vand.u32 2147483647, %v950_v9 }
 0x294   : > { %v1019_v54 = vsub.f32 1.0, %v1018_v3  ;;  %v2837_v14 = vmul.f32 %v2778_v19, %v1015_v13  ;;  %vm1037_vm1 = vweird.f32 %v950_v9  ;;  %vm1556_vm12 = vcmask 523264  }
 0x295   : > { %v1044_v7 = vor.u32 1.1754944e-38, %v1043_v29  ;;  %vm1042_vm3 = vcmp.eq.f32.partialorder %v1041_v31, 8.507059e+37 }
 0x296   : > { %v1020_v15 = vmul.f32 %v2287_v57, %v1019_v54  ;;  %2140 = vmatmul.msk.f32.gmra.mxu2 %vm884_vm10, %v2837_v14  ;;  %2148 = vmatmul.msk.f32.gmra.mxu3 %vm884_vm10, %v2837_v14  ;;  %v1329_v51 = vsel %vm884_vm10, %v2837_v14, 0.0 }
 0x298   : > { %v1021_v46 = vadd.f32 %v2287_v57, %v1020_v15 }
 0x299   : > { %v2289_v22 = vpop.eup %2288 }
 0x29a   : > { %v1033_v17 = vmul.f32 %v2289_v22, %v950_v9  ;;  %v953_v4 = vpop.xlane.xlu1 %952  ;;  %v1025_v21 = vsel %vm1024_vm13, %v2287_v57, %v1021_v46  ;;  %vm1038_vm15 = vweird.f32 %v2289_v22 }
 0x29b   : > { %2290 = vrcp.f32 %v953_v4  ;;  %v1030_v37 = vsel %vm1027_vm14, %v1029_v58, %v1025_v21  ;;  %vm1039_vm2 = vmor %vm1037_vm1, %vm1038_vm15  ;;  %v1058_v10 = vand.u32 2147483648, %v953_v4  ;;  %v1056_v41 = vand.u32 2147483647, %v953_v4  ;;  %v2901_v21 = vld [vmem:[%s3378_s5 + $0x68] sm:$0xff] }
 0x29c   : > { %v1034_v19 = vsub.f32 1.0, %v1033_v17  ;;  %v2844_v26 = vmul.f32 %v2798_v56, %v1030_v37  ;;  %vm1052_vm5 = vweird.f32 %v953_v4  ;;  %v2879_v17 = vpop.f32.mrf.mxu1  ;;  %vm1523_vm1 = vcmask 1040384  }
 0x29d   : > { %v1059_v44 = vor.u32 1.1754944e-38, %v1058_v10  ;;  %vm1057_vm7 = vcmp.eq.f32.partialorder %v1056_v41, 8.507059e+37  ;;  %v2952_v10 = vld [vmem:[%s3378_s5 + $0x40] sm:$0xff] }
 0x29e   : > { %v1035_v28 = vmul.f32 %v2289_v22, %v1034_v19  ;;  %2141 = vmatmul.msk.f32.gmra.mxu2 %vm884_vm10, %v2844_v26  ;;  %2149 = vmatmul.msk.f32.gmra.mxu3 %vm884_vm10, %v2844_v26  ;;  %v1331_v59 = vsel %vm884_vm10, %v2844_v26, 0.0 }
 0x2a0   : > { %v1036_v32 = vadd.f32 %v2289_v22, %v1035_v28  ;;  %v2917_v28 = vld [vmem:[%s3378_s5 + $0x58] sm:$0xff] }
 0x2a1   : > { %v2291_v34 = vpop.eup %2290 }
 0x2a2   : > { %v1048_v23 = vmul.f32 %v2291_v34, %v953_v4  ;;  %v956_v33 = vpop.xlane.xlu2 %955  ;;  %v1040_v30 = vsel %vm1039_vm2, %v2289_v22, %v1036_v32  ;;  %vm1053_vm4 = vweird.f32 %v2291_v34  ;;  %v2881_v4 = vpop.f32.mrf.mxu0 }
 0x2a3   : > { %2292 = vrcp.f32 %v956_v33  ;;  %v1045_v36 = vsel %vm1042_vm3, %v1044_v7, %v1040_v30  ;;  %vm1054_vm6 = vmor %vm1052_vm5, %vm1053_vm4  ;;  %v1073_v6 = vand.u32 2147483648, %v956_v33  ;;  %v1071_v55 = vand.u32 2147483647, %v956_v33  ;;  %v2932_v7 = vld [vmem:[%s3378_s5 + $0x50] sm:$0xff] }
 0x2a4   : > { %v1049_v56 = vsub.f32 1.0, %v1048_v23  ;;  %v1046_v39 = vmul.f32 %v2802_v11, %v1045_v36  ;;  %v1327_v11 = vsel %vm884_vm10, %v2830_v60, 0.0  ;;  %vm1067_vm9 = vweird.f32 %v956_v33  ;;  %v2937_v23 = vld [vmem:[%s3378_s5 + $0x48] sm:$0xff] }
 0x2a5   : > { %v1328_v52 = vadd.f32 %v1327_v11, %v1326_v49  ;;  %vm1072_vm11 = vcmp.eq.f32.partialorder %v1071_v55, 8.507059e+37  ;;  %v1107_v11 = vld [vmem:[%s3378_s5 + $0xe0] sm:$0xff]  ;;  %v3013_v55 = vld [vmem:[%s3378_s5 + $0x18] sm:$0xff] }
 0x2a6   : > { %v1050_v40 = vmul.f32 %v2291_v34, %v1049_v56  ;;  %2142 = vmatmul.msk.f32.gmra.mxu2 %vm884_vm10, %v1046_v39  ;;  %2150 = vmatmul.msk.f32.gmra.mxu3 %vm884_vm10, %v1046_v39  ;;  %v1333_v63 = vsel %vm884_vm10, %v1046_v39, 0.0 }
 0x2a7   : > { %v1330_v53 = vadd.f32 %v1329_v51, %v1328_v52  ;;  %v1105_v51 = vld [vmem:[%s3378_s5 + $0xd0] sm:$0xff]  ;;  %v3004_v52 = vld [vmem:[%s3378_s5 + $0x20] sm:$0xff] }
 0x2a8   : > { %v1051_v24 = vadd.f32 %v2291_v34, %v1050_v40  ;;  %v1110_v40 = vld [vmem:[%s3378_s5 + $0xf8] sm:$0xff] }
 0x2a9   : > { %v2293_v25 = vpop.eup %2292  ;;  %v1332_v1 = vadd.f32 %v1331_v59, %v1330_v53  ;;  %v1102_v53 = vld [vmem:[%s3378_s5 + $0xb8] sm:$0xff] }
 0x2aa   : > { %v1063_v0 = vmul.f32 %v2293_v25, %v956_v33  ;;  %v1055_v48 = vsel %vm1054_vm6, %v2291_v34, %v1051_v24  ;;  %vm1068_vm8 = vweird.f32 %v2293_v25  ;;  %v1109_v24 = vld [vmem:[%s3378_s5 + $0xf0] sm:$0xff] }
 0x2ab   : > { %v1060_v18 = vsel %vm1057_vm7, %v1059_v44, %v1055_v48  ;;  %vm1069_vm0 = vmor %vm1067_vm9, %vm1068_vm8  ;;  %v1334_v3 = vadd.f32 %v1333_v63, %v1332_v1  ;;  %v1108_v44 = vld [vmem:[%s3378_s5 + $0xe8] sm:$0xff]  ;;  %v3023_v1 = vld [vmem:[%s3378_s5 + $0x10] sm:$0xff] }
 0x2ac   : > { %v1064_v38 = vsub.f32 1.0, %v1063_v0  ;;  %v1061_v47 = vmul.f32 %v2806_v16, %v1060_v18  ;;  %v1074_v16 = vor.u32 1.1754944e-38, %v1073_v6  ;;  %v1106_v0 = vld [vmem:[%s3378_s5 + $0xd8] sm:$0xff]  ;;  %v2987_v18 = vld [vmem:[%s3378_s5 + $0x30] sm:$0xff]  ;;  %v1103_v6 = vld [vmem:[%s3378_s5 + $0xc0] sm:$0xff] }
 0x2ae   : > { %v1065_v50 = vmul.f32 %v2293_v25, %v1064_v38  ;;  %2143 = vmatmul.msk.f32.gmra.mxu2 %vm884_vm10, %v1061_v47  ;;  %2151 = vmatmul.msk.f32.gmra.mxu3 %vm884_vm10, %v1061_v47  ;;  %v1335_v57 = vsel %vm884_vm10, %v1061_v47, 0.0  ;;  %v2996_v38 = vld [vmem:[%s3378_s5 + $0x28] sm:$0xff] }
 0x2af   : > { %v1336_v54 = vadd.f32 %v1335_v57, %v1334_v3  ;;  %v3032_v57 = vld [vmem:[%s3378_s5 + $0x8] sm:$0xff] }
 0x2b0   : > { %v1066_v61 = vadd.f32 %v2293_v25, %v1065_v50 }
 0x2b2   : > { %v1070_v2 = vsel %vm1069_vm0, %v2293_v25, %v1066_v61 }
 0x2b3   : > { %v1075_v9 = vsel %vm1072_vm11, %v1074_v16, %v1070_v2  ;;  %v1101_v16 = vld [vmem:[%s3378_s5 + $0xb0] sm:$0xff]  ;;  %v1100_v2 = vld [vmem:[%s3378_s5 + $0xa8] sm:$0xff] }
 0x2b4   : > { %v1076_v12 = vmul.f32 %v2810_v8, %v1075_v9 }
 0x2b6   : > { %v1337_v13 = vsel %vm884_vm10, %v1076_v12, 0.0  ;;  %1635 = vmatpush.msrb.mxu0 %v1076_v12  ;;  %2144 = vmatmul.msk.f32.gmra.mxu2 %vm884_vm10, %v1076_v12 }
 0x2b7   : > { %v1338_v15 = vadd.f32 %v1337_v13, %v1336_v54  ;;  %2152 = vmatmul.msk.f32.gmra.mxu3 %vm884_vm10, %v1076_v12  ;;  %v3049_v12 = vld [vmem:[%s3378_s5] sm:$0xff] }
 0x2b8   : > { %1636 = vmatpush.msrb.mxu0 %v1061_v47  ;;  %v1104_v47 = vld [vmem:[%s3378_s5 + $0xc8] sm:$0xff]  ;;  %v1099_v54 = vld [vmem:[%s3378_s5 + $0xa0] sm:$0xff] }
 0x2b9   : > { %v1339_v20 = vrot.slane %v1338_v15, 4 }
 0x2ba   : > { %1637 = vmatpush.msrb.mxu0 %v1046_v39  ;;  %v2957_v39 = vld [vmem:[%s3378_s5 + $0x38] sm:$0xff] }
 0x2bb   : > { %v1340_v27 = vadd.f32 %v1339_v20, %v1338_v15 }
 0x2bc   : > { %1638 = vmatpush.msrb.mxu0 %v2844_v26  ;;  %v2912_v26 = vld [vmem:[%s3378_s5 + $0x60] sm:$0xff] }
 0x2bd   : > { %v1341_v46 = vrot.slane %v1340_v27, 2 }
 0x2be   : > { %1639 = vmatpush.msrb.mxu0 %v2837_v14  ;;  %v2886_v14 = vld [vmem:[%s3378_s5 + $0x78] sm:$0xff] }
 0x2bf   : > { %v1342_v22 = vadd.f32 %v1341_v46, %v1340_v27  ;;  %1425 = vmatpush.msra.mxu2 %v2886_v14 }
 0x2c0   : > { %1640 = vmatpush.msrb.mxu0 %v2830_v60  ;;  %v2889_v60 = vpop.f32.mrf.mxu1 }
 0x2c1   : > { %v1343_v8 = vrot.slane %v1342_v22, 1 }
 0x2c2   : > { %1641 = vmatpush.msrb.mxu0 %v2823_v45  ;;  %v2891_v45 = vpop.f32.mrf.mxu0 }
 0x2c3   : > { %v1344_v58 = vadd.f32 %v1343_v8, %v1342_v22  ;;  %v1098_v8 = vld [vmem:[%s3378_s5 + $0x98] sm:$0xff] }
 0x2c4   : > { %1642 = vmatpush.msrb.mxu0 %v2815_v35  ;;  %v2896_v35 = vld [vmem:[%s3378_s5 + $0x70] sm:$0xff] }
 0x2c5   : > { %2169 = vmatmul.msk.f32.vlgmr.msra.gmra.mxu3 %vm884_vm10, %v1344_v58  ;;  %1426 = vmatpush.msra.mxu2 %v2896_v35 }
 0x2c6   : > { %1445 = vmatpush.msra.mxu3 %v1110_v40  ;;  %1787 = vmatpush.msra.mxu0 %v1110_v40  ;;  %v1095_v40 = vld [vmem:[%s3378_s5 + $0x80] sm:$0xff] }
 0x2c7   : > { %1427 = vmatpush.msra.mxu2 %v2901_v21 }
 0x2c8   : > { %v2920_v29 = vpop.f32.mrf.mxu1  ;;  %1446 = vmatpush.msra.mxu3 %v1109_v24  ;;  %1788 = vmatpush.msra.mxu0 %v1109_v24 }
 0x2c9   : > { %1428 = vmatpush.msra.mxu2 %v2912_v26 }
 0x2ca   : > { %v2922_v31 = vpop.f32.mrf.mxu0  ;;  %1447 = vmatpush.msra.mxu3 %v1108_v44  ;;  %1789 = vmatpush.msra.mxu0 %v1108_v44 }
 0x2cb   : > { %1429 = vmatpush.msra.mxu2 %v2917_v28 }
 0x2cc   : > { %1448 = vmatpush.msra.mxu3 %v1107_v11  ;;  %1790 = vmatpush.msra.mxu0 %v1107_v11 }
 0x2cd   : > { %2170 = vmatmul.msk.f32.vlgmr.msrb.gmra.mxu3 %vm884_vm10, %v1344_v58  ;;  %1430 = vmatpush.msra.mxu2 %v2932_v7 }
 0x2ce   : > { %1449 = vmatpush.msra.mxu3 %v1106_v0  ;;  %1791 = vmatpush.msra.mxu0 %v1106_v0 }
 0x2cf   : > { %1431 = vmatpush.msra.mxu2 %v2937_v23 }
 0x2d0   : > { %v2941_v33 = vpop.f32.mrf.mxu1  ;;  %1450 = vmatpush.msra.mxu3 %v1105_v51  ;;  %1792 = vmatpush.msra.mxu0 %v1105_v51 }
 0x2d1   : > { %1432 = vmatpush.msra.mxu2 %v2952_v10 }
 0x2d2   : > { %v2943_v30 = vpop.f32.mrf.mxu0  ;;  %1451 = vmatpush.msra.mxu3 %v1104_v47  ;;  %1793 = vmatpush.msra.mxu0 %v1104_v47 }
 0x2d3   : > { %1433 = vmatpush.msra.mxu2 %v2957_v39 }
 0x2d4   : > { %1452 = vmatpush.msra.mxu3 %v1103_v6  ;;  %1794 = vmatpush.msra.mxu0 %v1103_v6 }
 0x2d5   : > { %1434 = vmatpush.msra.mxu2 %v2987_v18 }
 0x2d6   : > { %1453 = vmatpush.msra.mxu3 %v1102_v53  ;;  %1795 = vmatpush.msra.mxu0 %v1102_v53 }
 0x2d7   : > { %1435 = vmatpush.msra.mxu2 %v2996_v38 }
 0x2d8   : > { %v2971_v25 = vpop.f32.mrf.mxu1  ;;  %1454 = vmatpush.msra.mxu3 %v1101_v16  ;;  %1796 = vmatpush.msra.mxu0 %v1101_v16 }
 0x2d9   : > { %1436 = vmatpush.msra.mxu2 %v3004_v52 }
 0x2da   : > { %v2973_v43 = vpop.f32.mrf.mxu0  ;;  %1455 = vmatpush.msra.mxu3 %v1100_v2  ;;  %1797 = vmatpush.msra.mxu0 %v1100_v2 }
 0x2db   : > { %1437 = vmatpush.msra.mxu2 %v3013_v55 }
 0x2dc   : > { %1456 = vmatpush.msra.mxu3 %v1099_v54  ;;  %1798 = vmatpush.msra.mxu0 %v1099_v54  ;;  %v1119_v54 = vld [vmem:[%s3375_s2] sm:$0x3] }
 0x2dd   : > { %1438 = vmatpush.msra.mxu2 %v3023_v1 }
 0x2de   : > { %1457 = vmatpush.msra.mxu3 %v1098_v8  ;;  %1799 = vmatpush.msra.mxu0 %v1098_v8 }
 0x2df   : > { %1439 = vmatpush.msra.mxu2 %v3032_v57 }
 0x2e0   : > { %v1299_v59 = vpop.f32.mrf.mxu1 }
 0x2e1   : > { %1440 = vmatpush.msra.mxu2 %v3049_v12 }
 0x2e2   : > { %v1258_v50 = vpop.f32.mrf.mxu0 }
 0x2e3   : > { %1494 = vmatpush.msrb.mxu2 %v2790_v5  ;;  %v1097_v5 = vld [vmem:[%s3378_s5 + $0x90] sm:$0xff] }
 0x2e4   : > { %1458 = vmatpush.msra.mxu3 %v1097_v5  ;;  %1800 = vmatpush.msra.mxu0 %v1097_v5 }
 0x2e8   : > { %v1302_v15 = vpop.f32.mrf.mxu1 }
 0x2ea   : > { %v1261_v20 = vpop.f32.mrf.mxu0 }
 0x2f2   : > { %v1264_v44 = vpop.f32.mrf.mxu0 }
 0x301   : > { %v2905_v19 = vpop.f32.mrf.mxu2  ;;  %v2907_v37 = vpop.f32.mrf.mxu3 }
 0x302   : > { %v3056_v13 = vmul.f32 %v2881_v4, %v2905_v19  ;;  %v3060_v27 = vmul.f32 %v2879_v17, %v2907_v37 }
 0x309   : > { %v2925_v32 = vpop.f32.mrf.mxu2  ;;  %v2927_v34 = vpop.f32.mrf.mxu3 }
 0x30a   : > { %v3039_v3 = vmul.f32 %v2891_v45, %v2925_v32  ;;  %v3043_v9 = vmul.f32 %v2889_v60, %v2927_v34  ;;  %v1096_v34 = vld [vmem:[%s3378_s5 + $0x88] sm:$0xff] }
 0x30b   : > { %1459 = vmatpush.msra.mxu3 %v1096_v34  ;;  %1801 = vmatpush.msra.mxu0 %v1096_v34 }
 0x30c   : > { %v1345_v58 = vadd.f32 %v3039_v3, %v3056_v13  ;;  %v1358_v17 = vadd.f32 %v3043_v9, %v3060_v27 }
 0x30d   : > { %1460 = vmatpush.msra.mxu3 %v1095_v40  ;;  %1802 = vmatpush.msra.mxu0 %v1095_v40 }
 0x30f   : > { %1514 = vmatpush.msrb.mxu3 %v2785_v62 }
 0x311   : > { %v2945_v56 = vpop.f32.mrf.mxu2  ;;  %v2947_v36 = vpop.f32.mrf.mxu3 }
 0x312   : > { %v3064_v46 = vmul.f32 %v2922_v31, %v2945_v56  ;;  %v3068_v22 = vmul.f32 %v2920_v29, %v2947_v36 }
 0x314   : > { %v1346_v37 = vadd.f32 %v1345_v58, %v3064_v46  ;;  %v1359_v29 = vadd.f32 %v1358_v17, %v3068_v22  ;;  %v3115_v58 = vperm.slane %v1119_v54, 0  ;;  %v3120_v17 = vld [vmem:[%s3376_s3] sm:$0xff] }
 0x315   : > { %2181 = vmatmul.msk.f32.vlgmr.msrb.gmra.mxu0 %vm1556_vm12, %v3120_v17 }
 0x319   : > { %v2964_v41 = vpop.f32.mrf.mxu2  ;;  %v2966_v42 = vpop.f32.mrf.mxu3 }
 0x31a   : > { %v3081_v4 = vmul.f32 %v2943_v30, %v2964_v41  ;;  %v3085_v60 = vmul.f32 %v2941_v33, %v2966_v42 }
 0x31c   : > { %v1347_v33 = vadd.f32 %v1346_v37, %v3081_v4  ;;  %v1360_v30 = vadd.f32 %v1359_v29, %v3085_v60 }
 0x321   : > { %v1173_v48 = vpop.f32.mrf.mxu2  ;;  %v1214_v49 = vpop.f32.mrf.mxu3 }
 0x322   : > { %v3093_v31 = vmul.f32 %v2973_v43, %v1173_v48  ;;  %v3096_v32 = vmul.f32 %v2971_v25, %v1214_v49  ;;  %v1305_v43 = vpop.f32.mrf.mxu1 }
 0x324   : > { %v1348_v41 = vadd.f32 %v1347_v33, %v3093_v31  ;;  %v1361_v42 = vadd.f32 %v1360_v30, %v3096_v32  ;;  %v3130_v33 = vld [vmem:[%s3376_s3 + $0x8] sm:$0xff] }
 0x325   : > { %2182 = vmatmul.msk.f32.gmra.mxu0 %vm1556_vm12, %v3130_v33 }
 0x329   : > { %v1176_v61 = vpop.f32.mrf.mxu2  ;;  %v1217_v63 = vpop.f32.mrf.mxu3 }
 0x32a   : > { %v1318_v56 = vmul.f32 %v1258_v50, %v1176_v61  ;;  %v3103_v36 = vmul.f32 %v1299_v59, %v1217_v63 }
 0x32c   : > { %v1349_v11 = vadd.f32 %v1348_v41, %v1318_v56  ;;  %v1362_v0 = vadd.f32 %v1361_v42, %v3103_v36  ;;  %v3134_v41 = vperm.slane %v1119_v54, 1 }
 0x331   : > { %v1179_v45 = vpop.f32.mrf.mxu2  ;;  %v1220_v19 = vpop.f32.mrf.mxu3 }
 0x332   : > { %v1320_v24 = vmul.f32 %v1261_v20, %v1179_v45  ;;  %v1321_v25 = vmul.f32 %v1302_v15, %v1220_v19 }
 0x334   : > { %v1350_v51 = vadd.f32 %v1349_v11, %v1320_v24  ;;  %v1363_v47 = vadd.f32 %v1362_v0, %v1321_v25  ;;  %v1554_v0 = vld [vmem:[%s3376_s3 + $0x10] sm:$0xff] }
 0x335   : > { %2183 = vmatmul.msk.f32.gmra.mxu0 %vm1556_vm12, %v1554_v0 }
 0x339   : > { %v1182_v48 = vpop.f32.mrf.mxu2 }
 0x33a   : > { %v1223_v49 = vpop.f32.mrf.mxu3  ;;  %v1322_v6 = vmul.f32 %v1264_v44, %v1182_v48 }
 0x33b   : > { %v1323_v59 = vmul.f32 %v1305_v43, %v1223_v49 }
 0x33c   : > { %v1351_v50 = vadd.f32 %v1350_v51, %v1322_v6 }
 0x33d   : > { %v1364_v53 = vadd.f32 %v1363_v47, %v1323_v59 }
 0x33e   : > { %v1352_v61 = vrot.slane %v1351_v50, 4 }
 0x33f   : > { %v1365_v63 = vrot.slane %v1364_v53, 4 }
 0x340   : > { %v1353_v16 = vadd.f32 %v1352_v61, %v1351_v50 }
 0x341   : > { %v1366_v2 = vadd.f32 %v1365_v63, %v1364_v53 }
 0x342   : > { %v1354_v15 = vrot.slane %v1353_v16, 2 }
 0x343   : > { %v1367_v20 = vrot.slane %v1366_v2, 2 }
 0x344   : > { %v1355_v8 = vadd.f32 %v1354_v15, %v1353_v16 }
 0x345   : > { %v1368_v29 = vadd.f32 %v1367_v20, %v1366_v2 }
 0x346   : > { %v1356_v45 = vrot.slane %v1355_v8, 1 }
 0x347   : > { %v1369_v40 = vrot.slane %v1368_v29, 1 }
 0x348   : > { %v1391_v19 = vpop.f32.mrf.mxu3  ;;  %v1357_v5 = vadd.f32 %v1356_v45, %v1355_v8 }
 0x349   : > { %v1419_v37 = vmul.f32 %v3115_v58, %v1391_v19  ;;  %v1370_v43 = vadd.f32 %v1369_v40, %v1368_v29 }
 0x34b   : > { %v3125_v34 = vsub.f32 %v1357_v5, %v1419_v37 }
 0x34d   : > { %v1423_v30 = vmul.f32 %v3125_v34, %v3125_v34 }
 0x34f   : > { %1441 = vmatmul.f32.vlgmr.msra.gmra.mxu2 %v1423_v30 }
 0x350   : > { %1577 = vmatpush.msra.mxu2 %v1322_v6  ;;  %v1411_v42 = vpop.f32.mrf.mxu3 }
 0x351   : > { %v1420_v44 = vmul.f32 %v3134_v41, %v1411_v42 }
 0x352   : > { %1578 = vmatpush.msra.mxu2 %v1320_v24 }
 0x353   : > { %v3139_v11 = vsub.f32 %v1370_v43, %v1420_v44 }
 0x354   : > { %1579 = vmatpush.msra.mxu2 %v1318_v56  ;;  %v1555_v56 = vld [vmem:[%s3376_s3 + $0x18] sm:$0x1] }
 0x355   : > { %v1424_v48 = vmul.f32 %v3139_v11, %v3139_v11  ;;  %2184 = vmatmul.msk.f32.gmra.mxu0 %vm1556_vm12, %v1555_v56 }
 0x356   : > { %1580 = vmatpush.msra.mxu2 %v3093_v31 }
 0x357   : > { %1461 = vmatmul.f32.vlgmr.msra.gmra.mxu3 %v1424_v48 }
 0x358   : > { %1581 = vmatpush.msra.mxu2 %v3081_v4  ;;  %1606 = vmatpush.msra.mxu3 %v1323_v59 }
 0x35a   : > { %1582 = vmatpush.msra.mxu2 %v3064_v46  ;;  %1607 = vmatpush.msra.mxu3 %v1321_v25 }
 0x35c   : > { %1583 = vmatpush.msra.mxu2 %v3039_v3  ;;  %1608 = vmatpush.msra.mxu3 %v3103_v36 }
 0x35e   : > { %1584 = vmatpush.msra.mxu2 %v3056_v13  ;;  %1609 = vmatpush.msra.mxu3 %v3096_v32 }
 0x360   : > { %1610 = vmatpush.msra.mxu3 %v3085_v60 }
 0x362   : > { %1611 = vmatpush.msra.mxu3 %v3068_v22 }
 0x364   : > { %1612 = vmatpush.msra.mxu3 %v3043_v9 }
 0x366   : > { %1613 = vmatpush.msra.mxu3 %v3060_v27 }
 0x392   : > { %v1644_v3 = vpop.f32.mrf.mxu0 }
 0x393   : > { %2185 = vmatmul.msk.f32.vlgmr.msrb.gmra.mxu1 %vm884_vm10, %v1644_v3 }
 0x3a2   : > { %v1647_v13 = vpop.f32.mrf.mxu0 }
 0x3a3   : > { %2186 = vmatmul.msk.f32.gmra.mxu1 %vm884_vm10, %v1647_v13 }
 0x3b2   : > { %v1650_v25 = vpop.f32.mrf.mxu0 }
 0x3b3   : > { %2187 = vmatmul.msk.f32.gmra.mxu1 %vm884_vm10, %v1650_v25 }
 0x3d2   : > { %v1442_v46 = vpop.f32.mrf.mxu2  ;;  %v1653_v51 = vpop.f32.mrf.mxu0 }
 0x3d3   : > { %2188 = vmatmul.msk.f32.gmra.mxu1 %vm884_vm10, %v1653_v51 }
 0x3da   : > { %v1462_v4 = vpop.f32.mrf.mxu3 }
 0x3db   : > { %v1463_v31 = vadd.f32 %v1462_v4, %v1442_v46 }
 0x3dd   : > { %v1465_v36 = vmax.f32 %v1463_v31, 1e-24 }
 0x3df   : > { %2294 = vrsqrt.f32 %v1465_v36  ;;  %vm1472_vm14 = vweird.f32 %v1465_v36 }
 0x3e5   : > { %v2295_v32 = vpop.eup %2294 }
 0x3e6   : > { %v1467_v24 = vmul.f32 %v2295_v32, %v1465_v36  ;;  %vm1473_vm13 = vweird.f32 %v2295_v32 }
 0x3e7   : > { %vm1474_vm15 = vmor %vm1472_vm14, %vm1473_vm13 }
 0x3e8   : > { %v1468_v60 = vmul.f32 %v2295_v32, %v1467_v24 }
 0x3ea   : > { %v1469_v22 = vmul.f32 0.5, %v1468_v60 }
 0x3ec   : > { %v1470_v9 = vsub.f32 1.5, %v1469_v22 }
 0x3ee   : > { %v1471_v27 = vmul.f32 %v2295_v32, %v1470_v9 }
 0x3f0   : > { %v1475_v49 = vsel %vm1474_vm15, %v2295_v32, %v1471_v27 }
 0x3f1   : > { %2171 = vmatmul.msk.f32.vlgmr.msrb.gmra.mxu2 %vm884_vm10, %v1475_v49  ;;  %2172 = vmatmul.msk.f32.vlgmr.msrb.gmra.mxu3 %vm884_vm10, %v1475_v49 }
 0x3f2   : > { %1712 = vmatpush.msrb.mxu2 %v2785_v62  ;;  %1758 = vmatpush.msrb.mxu3 %v2886_v14 }
 0x3f4   : > { %1759 = vmatpush.msrb.mxu3 %v2896_v35 }
 0x3f6   : > { %1760 = vmatpush.msrb.mxu3 %v2901_v21 }
 0x3f8   : > { %1761 = vmatpush.msrb.mxu3 %v2912_v26 }
 0x3f9   : > { %2173 = vmatmul.msk.f32.vlgmr.msra.gmra.mxu2 %vm1556_vm12, %v3120_v17  ;;  %2177 = vmatmul.msk.f32.vlgmr.msra.gmra.mxu3 %vm1556_vm12, %v3120_v17 }
 0x3fa   : > { %1916 = vmatpush.msra.mxu2 %v2785_v62  ;;  %1762 = vmatpush.msrb.mxu3 %v2917_v28 }
 0x3fc   : > { %1763 = vmatpush.msrb.mxu3 %v2932_v7 }
 0x3fe   : > { %1764 = vmatpush.msrb.mxu3 %v2937_v23 }
 0x400   : > { %1765 = vmatpush.msrb.mxu3 %v2952_v10 }
 0x401   : > { %2174 = vmatmul.msk.f32.gmra.mxu2 %vm1556_vm12, %v3130_v33  ;;  %2178 = vmatmul.msk.f32.gmra.mxu3 %vm1556_vm12, %v3130_v33 }
 0x402   : > { %1766 = vmatpush.msrb.mxu3 %v2957_v39 }
 0x404   : > { %1767 = vmatpush.msrb.mxu3 %v2987_v18 }
 0x406   : > { %1768 = vmatpush.msrb.mxu3 %v2996_v38 }
 0x408   : > { %1769 = vmatpush.msrb.mxu3 %v3004_v52 }
 0x409   : > { %2175 = vmatmul.msk.f32.gmra.mxu2 %vm1556_vm12, %v1554_v0  ;;  %2179 = vmatmul.msk.f32.gmra.mxu3 %vm1556_vm12, %v1554_v0 }
 0x40a   : > { %1770 = vmatpush.msrb.mxu3 %v3013_v55 }
 0x40c   : > { %1771 = vmatpush.msrb.mxu3 %v3023_v1 }
 0x40e   : > { %1772 = vmatpush.msrb.mxu3 %v3032_v57 }
 0x410   : > { %1773 = vmatpush.msrb.mxu3 %v3049_v12  ;;  %v1685_v62 = vpop.f32.mrf.mxu1 }
 0x411   : > { %2176 = vmatmul.msk.f32.gmra.mxu2 %vm1556_vm12, %v1555_v56  ;;  %2180 = vmatmul.msk.f32.gmra.mxu3 %vm1556_vm12, %v1555_v56  ;;  %v1726_v23 = vmul.f32 %v1685_v62, %v3115_v58 }
 0x419   : > { %2189 = vmatmul.msk.f32.vlgmr.msrb.gmra.mxu2 %vm884_vm10, %v1644_v3 }
 0x420   : > { %v1688_v38 = vpop.f32.mrf.mxu1 }
 0x421   : > { %2190 = vmatmul.msk.f32.gmra.mxu2 %vm884_vm10, %v1647_v13  ;;  %v1728_v12 = vmul.f32 %v1688_v38, %v3115_v58 }
 0x429   : > { %2191 = vmatmul.msk.f32.gmra.mxu2 %vm884_vm10, %v1650_v25 }
 0x430   : > { %v1691_v6 = vpop.f32.mrf.mxu1 }
 0x431   : > { %2192 = vmatmul.msk.f32.gmra.mxu2 %vm884_vm10, %v1653_v51  ;;  %v1730_v61 = vmul.f32 %v1691_v6, %v3115_v58 }
 0x450   : > { %v1694_v2 = vpop.f32.mrf.mxu1 }
 0x451   : > { %v1732_v20 = vmul.f32 %v1694_v2, %v3115_v58 }
 0x474   : > { %v1496_v14 = vpop.f32.mrf.mxu2  ;;  %v1516_v35 = vpop.f32.mrf.mxu3 }
 0x475   : > { %v3203_v21 = vmul.f32 %v1496_v14, %v3125_v34  ;;  %v3206_v26 = vmul.f32 %v1516_v35, %v3139_v11  ;;  %v1547_v14 = vlaneseq }
 0x477   : > { %v1521_v28 = vmul.f32 %v3203_v21, %v3203_v21  ;;  %v1522_v7 = vmul.f32 %v3206_v26, %v3206_v26  ;;  %vm1549_vm5 = vcmp.lt.s32.totalorder %v1547_v14, 256 }
 0x479   : > { %v1524_v10 = vsel %vm1523_vm1, %v1521_v28, 0.0  ;;  %v1525_v39 = vsel %vm1523_vm1, %v1522_v7, 0.0 }
 0x47a   : > { %v1526_v18 = vadd.f32 %v1525_v39, %v1524_v10 }
 0x47c   : > { %v1586_v52 = vpop.f32.mrf.mxu2  ;;  %1527 = vadd.xlane.f32.xlu0 %v1526_v18  ;;  %v1615_v45 = vpop.f32.mrf.mxu3 }
 0x47d   : > { %v1734_v55 = vsub.f32 %v1586_v52, %v1726_v23 }
 0x47f   : > { %v3215_v1 = vmul.f32 0.0625, %v1734_v55 }
 0x481   : > { %v1750_v57 = vmul.f32 %v3215_v1, %v3215_v1 }
 0x483   : > { %1774 = vmatmul.f32.vlgmr.msrb.gmra.mxu3 %v1750_v57 }
 0x484   : > { %v1589_v47 = vpop.f32.mrf.mxu2  ;;  %v1618_v33 = vpop.f32.mrf.mxu3 }
 0x485   : > { %v1736_v59 = vsub.f32 %v1589_v47, %v1728_v12 }
 0x487   : > { %v3220_v50 = vmul.f32 0.0625, %v1736_v59 }
 0x489   : > { %v1752_v53 = vmul.f32 %v3220_v50, %v3220_v50 }
 0x48b   : > { %1777 = vmatmul.f32.gmra.mxu3 %v1752_v53 }
 0x48c   : > { %v1592_v63 = vpop.f32.mrf.mxu2  ;;  %v1621_v11 = vpop.f32.mrf.mxu3 }
 0x48d   : > { %v1738_v16 = vsub.f32 %v1592_v63, %v1730_v61 }
 0x48f   : > { %v3225_v54 = vmul.f32 0.0625, %v1738_v16 }
 0x491   : > { %v1754_v15 = vmul.f32 %v3225_v54, %v3225_v54 }
 0x493   : > { %1780 = vmatmul.f32.gmra.mxu3 %v1754_v15 }
 0x494   : > { %v1595_v8 = vpop.f32.mrf.mxu2  ;;  %v1624_v36 = vpop.f32.mrf.mxu3 }
 0x495   : > { %v1740_v17 = vsub.f32 %v1595_v8, %v1732_v20 }
 0x497   : > { %v3230_v19 = vmul.f32 0.0625, %v1740_v17 }
 0x499   : > { %v1756_v5 = vmul.f32 %v3230_v19, %v3230_v19 }
 0x49b   : > { %1783 = vmatmul.f32.gmra.mxu3 %v1756_v5 }
 0x49c   : > { %v1714_v37 = vpop.f32.mrf.mxu2 }
 0x49d   : > { %v1727_v29 = vmul.f32 %v1714_v37, %v3134_v41 }
 0x49f   : > { %v1735_v34 = vsub.f32 %v1615_v45, %v1727_v29 }
 0x4a1   : > { %v3235_v30 = vmul.f32 0.0625, %v1735_v34 }
 0x4a3   : > { %v1751_v58 = vmul.f32 %v3235_v30, %v3235_v30 }
 0x4a4   : > { %v1717_v40 = vpop.f32.mrf.mxu2 }
 0x4a5   : > { %v1729_v42 = vmul.f32 %v1717_v40, %v3134_v41  ;;  %1803 = vmatmul.f32.vlgmr.msra.gmra.mxu0 %v1751_v58 }
 0x4a7   : > { %v1737_v43 = vsub.f32 %v1618_v33, %v1729_v42 }
 0x4a9   : > { %v3240_v44 = vmul.f32 0.0625, %v1737_v43 }
 0x4ab   : > { %v1753_v0 = vmul.f32 %v3240_v44, %v3240_v44 }
 0x4ac   : > { %v1720_v48 = vpop.f32.mrf.mxu2 }
 0x4ad   : > { %v1731_v56 = vmul.f32 %v1720_v48, %v3134_v41  ;;  %1806 = vmatmul.f32.gmra.mxu0 %v1753_v0 }
 0x4af   : > { %v1739_v3 = vsub.f32 %v1621_v11, %v1731_v56 }
 0x4b1   : > { %v3245_v46 = vmul.f32 0.0625, %v1739_v3 }
 0x4b3   : > { %v1755_v4 = vmul.f32 %v3245_v46, %v3245_v46 }
 0x4b4   : > { %v1723_v31 = vpop.f32.mrf.mxu2 }
 0x4b5   : > { %v1733_v13 = vmul.f32 %v1723_v31, %v3134_v41  ;;  %1809 = vmatmul.f32.gmra.mxu0 %v1755_v4 }
 0x4b7   : > { %v1741_v32 = vsub.f32 %v1624_v36, %v1733_v13 }
 0x4b9   : > { %v3250_v24 = vmul.f32 0.0625, %v1741_v32 }
 0x4bb   : > { %v1757_v60 = vmul.f32 %v3250_v24, %v3250_v24 }
 0x4bd   : > { %1812 = vmatmul.f32.gmra.mxu0 %v1757_v60 }
 0x4ef   : > { %v1528_v25 = vpop.xlane.xlu0 %1527 }
 0x4f0   : > { %v1529_v22 = vmax.f32 %v1528_v25, 1e-24 }
 0x4f2   : > { %2296 = vrsqrt.f32 %v1529_v22  ;;  %vm1536_vm3 = vweird.f32 %v1529_v22 }
 0x4f8   : > { %v2297_v9 = vpop.eup %2296 }
 0x4f9   : > { %v1531_v27 = vmul.f32 %v2297_v9, %v1529_v22  ;;  %vm1537_vm2 = vweird.f32 %v2297_v9 }
 0x4fa   : > { %vm1538_vm4 = vmor %vm1536_vm3, %vm1537_vm2 }
 0x4fb   : > { %v1532_v49 = vmul.f32 %v2297_v9, %v1531_v27 }
 0x4fd   : > { %v1533_v51 = vmul.f32 0.5, %v1532_v49 }
 0x4ff   : > { %v1534_v62 = vsub.f32 1.5, %v1533_v51 }
 0x501   : > { %v1535_v41 = vmul.f32 %v2297_v9, %v1534_v62 }
 0x503   : > { %v1539_v35 = vsel %vm1538_vm4, %v2297_v9, %v1535_v41 }
 0x504   : > { %v1541_v28 = vmul.f32 %v1539_v35, %v3206_v26  ;;  %v1540_v7 = vmul.f32 %v1539_v35, %v3203_v21 }
 0x506   : > { %v1544_v23 = vrot.slane %v1541_v28, 7  ;;  %v1775_v39 = vpop.f32.mrf.mxu3 }
 0x508   : > { %v1545_v10 = vsel %vm1523_vm1, %v1540_v7, %v1544_v23 }
 0x509   : > { %1551 = vst.msk [vmem:[%s306_s10] sm:$0x3] %vm1549_vm5, %v1545_v10 }
 0x50e   : > { %v1778_v55 = vpop.f32.mrf.mxu3 }
 0x516   : > { %v1781_v21 = vpop.f32.mrf.mxu3 }
 0x51e   : > { %v1784_v5 = vpop.f32.mrf.mxu3 }
 0x522   : > { %v1804_v18 = vpop.f32.mrf.mxu0 }
 0x523   : > { %v1805_v38 = vadd.f32 %v1804_v18, %v1775_v39 }
 0x525   : > { %v1816_v52 = vmax.f32 %v1805_v38, 1e-24 }
 0x527   : > { %2298 = vrsqrt.f32 %v1816_v52  ;;  %vm1826_vm7 = vweird.f32 %v1816_v52 }
 0x52a   : > { %v1807_v57 = vpop.f32.mrf.mxu0 }
 0x52b   : > { %v1808_v12 = vadd.f32 %v1807_v57, %v1778_v55 }
 0x52d   : > { %v2299_v47 = vpop.eup %2298  ;;  %v1817_v6 = vmax.f32 %v1808_v12, 1e-24 }
 0x52e   : > { %v1821_v26 = vmul.f32 %v2299_v47, %v1816_v52  ;;  %vm1827_vm6 = vweird.f32 %v2299_v47 }
 0x52f   : > { %2300 = vrsqrt.f32 %v1817_v6  ;;  %vm1828_vm8 = vmor %vm1826_vm7, %vm1827_vm6  ;;  %vm1836_vm0 = vweird.f32 %v1817_v6 }
 0x530   : > { %v1822_v59 = vmul.f32 %v2299_v47, %v1821_v26 }
 0x532   : > { %v1823_v53 = vmul.f32 0.5, %v1822_v59  ;;  %v1810_v61 = vpop.f32.mrf.mxu0 }
 0x533   : > { %v1811_v63 = vadd.f32 %v1810_v61, %v1781_v21 }
 0x534   : > { %v1824_v16 = vsub.f32 1.5, %v1823_v53 }
 0x535   : > { %v2301_v2 = vpop.eup %2300  ;;  %v1818_v15 = vmax.f32 %v1811_v63, 1e-24 }
 0x536   : > { %v1825_v20 = vmul.f32 %v2299_v47, %v1824_v16  ;;  %v1831_v8 = vmul.f32 %v2301_v2, %v1817_v6  ;;  %vm1837_vm9 = vweird.f32 %v2301_v2 }
 0x537   : > { %2302 = vrsqrt.f32 %v1818_v15  ;;  %vm1838_vm11 = vmor %vm1836_vm0, %vm1837_vm9  ;;  %vm1846_vm13 = vweird.f32 %v1818_v15 }
 0x538   : > { %v1832_v17 = vmul.f32 %v2301_v2, %v1831_v8  ;;  %v1829_v45 = vsel %vm1828_vm8, %v2299_v47, %v1825_v20 }
 0x539   : > { %2193 = vmatmul.msk.f32.vlgmr.msra.gmra.mxu1 %vm884_vm10, %v1829_v45  ;;  %2197 = vmatmul.msk.f32.vlgmr.msra.gmra.mxu2 %vm884_vm10, %v1829_v45 }
 0x53a   : > { %v1833_v37 = vmul.f32 0.5, %v1832_v17  ;;  %v1813_v29 = vpop.f32.mrf.mxu0 }
 0x53b   : > { %v1814_v34 = vadd.f32 %v1813_v29, %v1784_v5 }
 0x53c   : > { %v1834_v33 = vsub.f32 1.5, %v1833_v37 }
 0x53d   : > { %v2303_v58 = vpop.eup %2302  ;;  %v1819_v40 = vmax.f32 %v1814_v34, 1e-24 }
 0x53e   : > { %v1841_v42 = vmul.f32 %v2303_v58, %v1818_v15  ;;  %v1835_v43 = vmul.f32 %v2301_v2, %v1834_v33  ;;  %vm1847_vm12 = vweird.f32 %v2303_v58 }
 0x53f   : > { %2304 = vrsqrt.f32 %v1819_v40  ;;  %vm1848_vm14 = vmor %vm1846_vm13, %vm1847_vm12  ;;  %vm1856_vm2 = vweird.f32 %v1819_v40 }
 0x540   : > { %v1842_v11 = vmul.f32 %v2303_v58, %v1841_v42  ;;  %v1839_v0 = vsel %vm1838_vm11, %v2301_v2, %v1835_v43 }
 0x541   : > { %2194 = vmatmul.msk.f32.gmra.mxu1 %vm884_vm10, %v1839_v0  ;;  %2198 = vmatmul.msk.f32.gmra.mxu2 %vm884_vm10, %v1839_v0 }
 0x542   : > { %v1843_v48 = vmul.f32 0.5, %v1842_v11 }
 0x544   : > { %v1844_v56 = vsub.f32 1.5, %v1843_v48 }
 0x545   : > { %v2305_v3 = vpop.eup %2304 }
 0x546   : > { %v1851_v4 = vmul.f32 %v2305_v3, %v1819_v40  ;;  %v1845_v31 = vmul.f32 %v2303_v58, %v1844_v56  ;;  %vm1857_vm15 = vweird.f32 %v2305_v3 }
 0x547   : > { %vm1858_vm3 = vmor %vm1856_vm2, %vm1857_vm15 }
 0x548   : > { %v1852_v36 = vmul.f32 %v2305_v3, %v1851_v4  ;;  %v1849_v13 = vsel %vm1848_vm14, %v2303_v58, %v1845_v31 }
 0x549   : > { %2195 = vmatmul.msk.f32.gmra.mxu1 %vm884_vm10, %v1849_v13  ;;  %2199 = vmatmul.msk.f32.gmra.mxu2 %vm884_vm10, %v1849_v13 }
 0x54a   : > { %v1853_v32 = vmul.f32 0.5, %v1852_v36 }
 0x54c   : > { %v1854_v60 = vsub.f32 1.5, %v1853_v32 }
 0x54e   : > { %v1855_v25 = vmul.f32 %v2305_v3, %v1854_v60 }
 0x550   : > { %v1859_v22 = vsel %vm1858_vm3, %v2305_v3, %v1855_v25 }
 0x551   : > { %2196 = vmatmul.msk.f32.gmra.mxu1 %vm884_vm10, %v1859_v22  ;;  %2200 = vmatmul.msk.f32.gmra.mxu2 %vm884_vm10, %v1859_v22 }
 0x5b6   : > { %v1889_v9 = vpop.f32.mrf.mxu1 }
 0x5b7   : > { %v3274_v27 = vmul.f32 %v1889_v9, %v3215_v1 }
 0x5b9   : > { %v1938_v41 = vmul.f32 %v3274_v27, %v3274_v27 }
 0x5bc   : > { %v1918_v49 = vpop.f32.mrf.mxu2 }
 0x5bd   : > { %v3277_v51 = vmul.f32 %v1918_v49, %v3235_v30 }
 0x5be   : > { %v1892_v62 = vpop.f32.mrf.mxu1 }
 0x5bf   : > { %v1939_v14 = vmul.f32 %v3277_v51, %v3277_v51  ;;  %v3284_v28 = vmul.f32 %v1892_v62, %v3220_v50 }
 0x5c1   : > { %v1946_v35 = vadd.f32 %v1939_v14, %v1938_v41  ;;  %v1940_v30 = vmul.f32 %v3284_v28, %v3284_v28 }
 0x5c3   : > { %1947 = vadd.xlane.f32.xlu1 %v1946_v35 }
 0x5c4   : > { %v1921_v7 = vpop.f32.mrf.mxu2 }
 0x5c5   : > { %v3287_v1 = vmul.f32 %v1921_v7, %v3240_v44 }
 0x5c6   : > { %v1895_v23 = vpop.f32.mrf.mxu1 }
 0x5c7   : > { %v1941_v10 = vmul.f32 %v3287_v1, %v3287_v1  ;;  %v3294_v18 = vmul.f32 %v1895_v23, %v3225_v54 }
 0x5c9   : > { %v1949_v39 = vadd.f32 %v1941_v10, %v1940_v30  ;;  %v1942_v44 = vmul.f32 %v3294_v18, %v3294_v18 }
 0x5cb   : > { %1950 = vadd.xlane.f32.xlu2 %v1949_v39 }
 0x5cc   : > { %v1924_v38 = vpop.f32.mrf.mxu2 }
 0x5cd   : > { %v3297_v50 = vmul.f32 %v1924_v38, %v3245_v46 }
 0x5ce   : > { %v1898_v52 = vpop.f32.mrf.mxu1 }
 0x5cf   : > { %v1943_v55 = vmul.f32 %v3297_v50, %v3297_v50  ;;  %v3304_v57 = vmul.f32 %v1898_v52, %v3230_v19 }
 0x5d1   : > { %v1952_v12 = vadd.f32 %v1943_v55, %v1942_v44  ;;  %v1944_v47 = vmul.f32 %v3304_v57, %v3304_v57 }
 0x5d3   : > { %1953 = vadd.xlane.f32.xlu0 %v1952_v12  ;;  %v1955_v26 = vsel %vm1523_vm1, %v1944_v47, 0.0 }
 0x5d4   : > { %v1927_v54 = vpop.f32.mrf.mxu2 }
 0x5d5   : > { %v3309_v46 = vmul.f32 %v1927_v54, %v3250_v24 }
 0x5d7   : > { %v1945_v6 = vmul.f32 %v3309_v46, %v3309_v46 }
 0x5d9   : > { %v1956_v21 = vsel %vm1523_vm1, %v1945_v6, 0.0 }
 0x5da   : > { %v1957_v19 = vadd.f32 %v1956_v21, %v1955_v26 }
 0x5dc   : > { %1958 = vadd.xlane.f32.xlu1 %v1957_v19 }
 0x5dd   : > { %2341 = shalt.err (!%p2338_p3)
}
 0x5de   : > { %2207 = dma.vmem_to_hbm [thread:$0]  (%p2461_p5), %s2042_s21, 32, %s2044_s22, %s2026_s23  }
 0x5df   : > { %s3395_s0 = sshll.u32 %s2473_s17, 6 }
 0x5e0   : > { %s3338_s18 = scalar_lea.vmem %s3380_s7, %s3395_s0 }
 0x636   : > { %v1948_v24 = vpop.xlane.xlu1 %1947 }
 0x637   : > { %v1960_v59 = vmax.f32 %v1948_v24, 1e-24 }
 0x639   : > { %2306 = vrsqrt.f32 %v1960_v59  ;;  %vm1970_vm1 = vweird.f32 %v1960_v59 }
 0x63e   : > { %v1951_v53 = vpop.xlane.xlu2 %1950 }
 0x63f   : > { %v2307_v61 = vpop.eup %2306  ;;  %v1961_v63 = vmax.f32 %v1951_v53, 1e-24 }
 0x640   : > { %v1965_v16 = vmul.f32 %v2307_v61, %v1960_v59  ;;  %vm1971_vm10 = vweird.f32 %v2307_v61 }
 0x641   : > { %2308 = vrsqrt.f32 %v1961_v63  ;;  %vm1972_vm4 = vmor %vm1970_vm1, %vm1971_vm10  ;;  %vm1980_vm6 = vweird.f32 %v1961_v63 }
 0x642   : > { %v1966_v2 = vmul.f32 %v2307_v61, %v1965_v16 }
 0x644   : > { %v1967_v15 = vmul.f32 0.5, %v1966_v2 }
 0x646   : > { %v1968_v20 = vsub.f32 1.5, %v1967_v15  ;;  %v1954_v8 = vpop.xlane.xlu0 %1953 }
 0x647   : > { %v2309_v17 = vpop.eup %2308  ;;  %v1962_v45 = vmax.f32 %v1954_v8, 1e-24 }
 0x648   : > { %v1969_v5 = vmul.f32 %v2307_v61, %v1968_v20  ;;  %v1975_v37 = vmul.f32 %v2309_v17, %v1961_v63  ;;  %vm1981_vm5 = vweird.f32 %v2309_v17 }
 0x649   : > { %2310 = vrsqrt.f32 %v1962_v45  ;;  %vm1982_vm7 = vmor %vm1980_vm6, %vm1981_vm5  ;;  %vm1990_vm9 = vweird.f32 %v1962_v45 }
 0x64a   : > { %v1973_v29 = vsel %vm1972_vm4, %v2307_v61, %v1969_v5  ;;  %v1976_v34 = vmul.f32 %v2309_v17, %v1975_v37 }
 0x64b   : > { %v2004_v33 = vmul.f32 %v1973_v29, %v3274_v27  ;;  %v2005_v58 = vmul.f32 %v1973_v29, %v3277_v51 }
 0x64c   : > { %v1977_v40 = vmul.f32 0.5, %v1976_v34 }
 0x64d   : > { %2012 = vst [vmem:[%s3338_s18] sm:$0xff] %v2004_v33 }
 0x64e   : > { %2013 = vst [vmem:[%s3338_s18 + $0x8] sm:$0xff] %v2005_v58  ;;  %v1978_v42 = vsub.f32 1.5, %v1977_v40 }
 0x64f   : > { %v2311_v43 = vpop.eup %2310  ;;  %v1959_v11 = vpop.xlane.xlu1 %1958 }
 0x650   : > { %v1979_v0 = vmul.f32 %v2309_v17, %v1978_v42  ;;  %v1985_v48 = vmul.f32 %v2311_v43, %v1962_v45  ;;  %v1963_v56 = vmax.f32 %v1959_v11, 1e-24  ;;  %vm1991_vm8 = vweird.f32 %v2311_v43 }
 0x651   : > { %vm1992_vm0 = vmor %vm1990_vm9, %vm1991_vm8 }
 0x652   : > { %v1983_v3 = vsel %vm1982_vm7, %v2309_v17, %v1979_v0  ;;  %v1986_v4 = vmul.f32 %v2311_v43, %v1985_v48  ;;  %2312 = vrsqrt.f32 %v1963_v56  ;;  %vm2000_vm12 = vweird.f32 %v1963_v56 }
 0x653   : > { %v2006_v31 = vmul.f32 %v1983_v3, %v3284_v28  ;;  %v2007_v36 = vmul.f32 %v1983_v3, %v3287_v1 }
 0x654   : > { %v1987_v13 = vmul.f32 0.5, %v1986_v4 }
 0x655   : > { %2014 = vst [vmem:[%s3338_s18 + $0x10] sm:$0xff] %v2006_v31 }
 0x656   : > { %2015 = vst [vmem:[%s3338_s18 + $0x18] sm:$0xff] %v2007_v36  ;;  %v1988_v32 = vsub.f32 1.5, %v1987_v13 }
 0x658   : > { %v2313_v60 = vpop.eup %2312  ;;  %v1989_v25 = vmul.f32 %v2311_v43, %v1988_v32 }
 0x659   : > { %v1995_v22 = vmul.f32 %v2313_v60, %v1963_v56  ;;  %vm2001_vm11 = vweird.f32 %v2313_v60 }
 0x65a   : > { %v1993_v9 = vsel %vm1992_vm0, %v2311_v43, %v1989_v25  ;;  %vm2002_vm13 = vmor %vm2000_vm12, %vm2001_vm11 }
 0x65b   : > { %v2008_v27 = vmul.f32 %v1993_v9, %v3294_v18  ;;  %v2009_v49 = vmul.f32 %v1993_v9, %v3297_v50  ;;  %v1996_v51 = vmul.f32 %v2313_v60, %v1995_v22 }
 0x65d   : > { %2016 = vst [vmem:[%s3338_s18 + $0x20] sm:$0xff] %v2008_v27  ;;  %v1997_v62 = vmul.f32 0.5, %v1996_v51 }
 0x65e   : > { %2017 = vst [vmem:[%s3338_s18 + $0x28] sm:$0xff] %v2009_v49 }
 0x65f   : > { %v1998_v41 = vsub.f32 1.5, %v1997_v62 }
 0x661   : > { %v1999_v14 = vmul.f32 %v2313_v60, %v1998_v41 }
 0x663   : > { %v2003_v35 = vsel %vm2002_vm13, %v2313_v60, %v1999_v14 }
 0x664   : > { %v2010_v28 = vmul.f32 %v2003_v35, %v3304_v57  ;;  %v2011_v7 = vmul.f32 %v2003_v35, %v3309_v46 }
 0x666   : > { %2018 = vst [vmem:[%s3338_s18 + $0x30] sm:$0x1] %v2010_v28 }
 0x667   : > { %2019 = vst [vmem:[%s3338_s18 + $0x38] sm:$0x1] %v2011_v7 }
 0x668 PF: > { %p2213_p4 = scmp.ge.s32.totalorder %s2376_s30, 2  ;;  %s2063_s17 = sand.u32 1, %s2364_s27  }
 0x669   : > { %s2064_s25 = scalar_lea.sflag [#allocation3], %s2063_s17 }
 0x66a   : > { %p2210_p5 = pnand %p2213_p4, %p2465_p6 }
 0x66c   : > { %p2211_p7 = pneg %p2210_p5 }
 0x66e   : > { %2359 = dma.done.wait (%p2211_p7), %s2064_s25, 32  }
 0x66f   : > { %2361 = vsyncadd (%p2211_p7), %s2064_s25, 4294967264  ;;  %p19_p8 = scmp.ge.s32.totalorder %s2448_s11, 4   ;;  %s3396_s27 = smov %s2368_s28 }
 0x670   : > { %s3397_s28 = smov %s2372_s29  ;;  %s3398_s29 = smov %s2459_s14 }
 0x671   : > { %s3399_s30 = smov %s2448_s11  ;;  %21 = sbr.rel (!%p19_p8) target bundleno = 6 (0x6), region = 95 }
 0x676   :  { %2070 = vsyncpa [#allocation3], 1 }
 0x677   :  { %2072 = vsyncpa [#allocation3 + $0x1], 1 }

</bundles_post_ra>
